<compile_context>
chip_gen: v7x
topology: tpu7x:2x2x1
jax: 0.10.0
libtpu: 0.0.40
codegen_flags: <defaults>
</compile_context>

<pallas_src>
import jax
import jax.numpy as jnp
from jax.experimental import pallas as pl
from jax.experimental.pallas import tpu as pltpu

# ----------------------------- problem sizes --------------------------------
BATCH, SEQ, DIM = 2, 64, 128          # x: (B, S, D); D=128 -> lane-dense
HIDDEN = 4 * DIM                      # fn's MLP hidden width
EPS = 1e-12                           # F.normalize default eps
SCALE = float(DIM) ** 0.5             # SimpleRMSNorm scale
DTYPE = jnp.float32


# ------------------------------ fused kernel --------------------------------
def _prenorm_residual_kernel(x_ref, w1_ref, b1_ref, w2_ref, b2_ref, o_ref):
    """out = fn(SimpleRMSNorm(x)) + x for one (TM, DIM) row tile, fully fused."""
    x = x_ref[...].astype(jnp.float32)                        # (TM, DIM)

    # SimpleRMSNorm == F.normalize(x, dim=-1) * sqrt(DIM)
    #   x / max(||x||, eps) == x * rsqrt(max(||x||^2, eps^2))  -> single EUP op
    sq = jnp.sum(x * x, axis=-1, keepdims=True)               # (TM, 1)
    inv = SCALE * jax.lax.rsqrt(jnp.maximum(sq, EPS * EPS))
    y = (x * inv).astype(jnp.bfloat16)                        # bf16 MXU operand

    # fn: Linear -> GELU(tanh, EUP path) -> Linear. bf16 operands, f32 accum.
    h = jnp.dot(y, w1_ref[...], preferred_element_type=jnp.float32)
    h = h + b1_ref[...].astype(jnp.float32)
    h = jax.nn.gelu(h, approximate=True).astype(jnp.bfloat16)
    z = jnp.dot(h, w2_ref[...], preferred_element_type=jnp.float32)
    z = z + b2_ref[...].astype(jnp.float32)

    # residual add fused into the store epilogue (x kept in f32 for accuracy)
    o_ref[...] = (z + x).astype(o_ref.dtype)


# ------------------------------ host wrapper ---------------------------------
def _choose_tm(M: int) -> int:
    """One row tile per TensorCore (v7x has 2 TCs), capped at 512 rows."""
    try:
        kind = jax.devices()[0].device_kind.lower()
    except Exception:  # pragma: no cover - defensive; default to single TC
        kind = ""
    n_tc = 2 if "v7" in kind else 1
    tm = M
    if n_tc > 1 and M % n_tc == 0 and (M // n_tc) % 8 == 0:
        tm = M // n_tc
    while tm > 512 and tm % 2 == 0 and M % (tm // 2) == 0:
        tm //= 2
    return tm


def prenorm_residual(x, w1, b1, w2, b2):
    B, S, D = x.shape
    M = B * S
    assert D == DIM
    TM = _choose_tm(M)
    assert M % TM == 0 and TM % 8 == 0

    x2 = x.reshape(M, D)                                      # lane-dense rows
    w1b = w1.astype(jnp.bfloat16)                             # bf16 weights:
    w2b = w2.astype(jnp.bfloat16)                             # half DMA bytes,
    b1r = b1.reshape(1, HIDDEN)                               # bf16-native MXU
    b2r = b2.reshape(1, D)

    out = pl.pallas_call(
        _prenorm_residual_kernel,
        out_shape=jax.ShapeDtypeStruct((M, D), x.dtype),
        grid=(M // TM,),
        in_specs=[
            pl.BlockSpec((TM, D), lambda i: (i, 0)),          # x row tile
            pl.BlockSpec((D, HIDDEN), lambda i: (0, 0)),      # w1 (resident)
            pl.BlockSpec((1, HIDDEN), lambda i: (0, 0)),      # b1 (resident)
            pl.BlockSpec((HIDDEN, D), lambda i: (0, 0)),      # w2 (resident)
            pl.BlockSpec((1, D), lambda i: (0, 0)),           # b2 (resident)
        ],
        out_specs=pl.BlockSpec((TM, D), lambda i: (i, 0)),
        input_output_aliases={0: 0},                          # out reuses x2's HBM
        compiler_params=pltpu.CompilerParams(
            dimension_semantics=("parallel",)),               # megacore on v7x
    )(x2, w1b, b1r, w2b, b2r)
    return out.reshape(B, S, D)


# ------------------------------ pure-JAX reference ---------------------------
def reference(x, w1, b1, w2, b2):
    xf = x.astype(jnp.float32)
    n = jnp.sqrt(jnp.sum(xf * xf, axis=-1, keepdims=True))
    y = xf / jnp.maximum(n, EPS) * SCALE                      # SimpleRMSNorm
    h = jax.nn.gelu(y @ w1 + b1, approximate=True)
    z = h @ w2 + b2
    return (z + xf).astype(x.dtype)                           # fn(norm(x)) + x


# ----------------------------------- main ------------------------------------
if __name__ == "__main__":
    key = jax.random.PRNGKey(0)
    kx, k1, k2 = jax.random.split(key, 3)
    x = jax.random.normal(kx, (BATCH, SEQ, DIM), dtype=DTYPE)
    w1 = (0.02 * jax.random.normal(k1, (DIM, HIDDEN))).astype(DTYPE)
    b1 = jnp.zeros((HIDDEN,), DTYPE)
    w2 = (0.02 * jax.random.normal(k2, (HIDDEN, DIM))).astype(DTYPE)
    b2 = jnp.zeros((DIM,), DTYPE)

    fwd = jax.jit(prenorm_residual)
    out = fwd(x, w1, b1, w2, b2)
    jax.block_until_ready(out)

    ref = reference(x, w1, b1, w2, b2)
    assert out.shape == (BATCH, SEQ, DIM), out.shape
    assert jnp.all(jnp.isfinite(out))
    assert jnp.allclose(out, ref, rtol=1e-2, atol=1e-2), \
        float(jnp.max(jnp.abs(out - ref)))
    print("KERNEL_OK")
</pallas_src>

<mosaic_0001>
module attributes {stable_mosaic.version = 11 : i64} {
  func.func @_prenorm_residual_kernel(%arg0: i32, %arg1: memref<128x128xf32, #tpu.memory_space<vmem>>, %arg2: memref<128x512xbf16, #tpu.memory_space<vmem>>, %arg3: memref<1x512xf32, #tpu.memory_space<vmem>>, %arg4: memref<512x128xbf16, #tpu.memory_space<vmem>>, %arg5: memref<1x128xf32, #tpu.memory_space<vmem>>, %arg6: memref<128x128xf32, #tpu.memory_space<vmem>>) attributes {dimension_semantics = [#tpu.dimension_semantics<parallel>], iteration_bounds = array<i64: 1>, scalar_prefetch = 0 : i64, scratch_operands = 0 : i64, tpu.core_type = #tpu.core_type<tc>, window_params = [{transform_indices = @transform_0, window_bounds = array<i64: 128, 128>}, {pipeline_mode = #tpu.pipeline_mode<synchronous>, transform_indices = @transform_1, window_bounds = array<i64: 128, 512>}, {pipeline_mode = #tpu.pipeline_mode<synchronous>, transform_indices = @transform_2, window_bounds = array<i64: 1, 512>}, {pipeline_mode = #tpu.pipeline_mode<synchronous>, transform_indices = @transform_3, window_bounds = array<i64: 512, 128>}, {pipeline_mode = #tpu.pipeline_mode<synchronous>, transform_indices = @transform_4, window_bounds = array<i64: 1, 128>}, {transform_indices = @transform_5, window_bounds = array<i64: 128, 128>}]} {
    %c0 = arith.constant 0 : index
    %c0_0 = arith.constant 0 : index
    %0 = vector.load %arg1[%c0, %c0_0] : memref<128x128xf32, #tpu.memory_space<vmem>>, vector<128x128xf32>
    %1 = arith.mulf %0, %0 : vector<128x128xf32>
    %cst = arith.constant dense<0.000000e+00> : vector<128xf32>
    %2 = vector.multi_reduction <add>, %1, %cst [1] : vector<128x128xf32> to vector<128xf32>
    %3 = vector.shape_cast %2 : vector<128xf32> to vector<128x1xf32>
    %cst_1 = arith.constant 1.000000e-24 : f32
    %4 = vector.broadcast %cst_1 : f32 to vector<128x1xf32>
    %5 = arith.maximumf %3, %4 : vector<128x1xf32>
    %6 = math.rsqrt %5 : vector<128x1xf32>
    %cst_2 = arith.constant 11.3137083 : f32
    %7 = vector.broadcast %cst_2 : f32 to vector<128x1xf32>
    %8 = arith.mulf %7, %6 : vector<128x1xf32>
    %9 = vector.broadcast %8 : vector<128x1xf32> to vector<128x128xf32>
    %10 = arith.mulf %0, %9 : vector<128x128xf32>
    %11 = arith.truncf %10 : vector<128x128xf32> to vector<128x128xbf16>
    %c0_3 = arith.constant 0 : index
    %c0_4 = arith.constant 0 : index
    %12 = vector.load %arg2[%c0_3, %c0_4] : memref<128x512xbf16, #tpu.memory_space<vmem>>, vector<128x512xbf16>
    %cst_5 = arith.constant dense<0.000000e+00> : vector<128x512xf32>
    %13 = tpu.matmul %11, %12, %cst_5 {dimension_numbers = #tpu.dot_dimension_numbers<[1], [0], [0], [1], [0, 0, 1, 1], [], []>} : vector<128x128xbf16>, vector<128x512xbf16>, vector<128x512xf32> -> vector<128x512xf32>
    %c0_6 = arith.constant 0 : index
    %c0_7 = arith.constant 0 : index
    %14 = vector.load %arg3[%c0_6, %c0_7] : memref<1x512xf32, #tpu.memory_space<vmem>>, vector<1x512xf32>
    %15 = vector.broadcast %14 : vector<1x512xf32> to vector<128x512xf32>
    %16 = arith.addf %13, %15 : vector<128x512xf32>
    %17 = arith.mulf %16, %16 : vector<128x512xf32>
    %18 = arith.mulf %16, %17 : vector<128x512xf32>
    %cst_8 = arith.constant 4.471500e-02 : f32
    %19 = vector.broadcast %cst_8 : f32 to vector<128x512xf32>
    %20 = arith.mulf %19, %18 : vector<128x512xf32>
    %21 = arith.addf %16, %20 : vector<128x512xf32>
    %cst_9 = arith.constant 0.797884583 : f32
    %22 = vector.broadcast %cst_9 : f32 to vector<128x512xf32>
    %23 = arith.mulf %22, %21 : vector<128x512xf32>
    %24 = math.tanh %23 : vector<128x512xf32>
    %cst_10 = arith.constant 1.000000e+00 : f32
    %25 = vector.broadcast %cst_10 : f32 to vector<128x512xf32>
    %26 = arith.addf %25, %24 : vector<128x512xf32>
    %cst_11 = arith.constant 5.000000e-01 : f32
    %27 = vector.broadcast %cst_11 : f32 to vector<128x512xf32>
    %28 = arith.mulf %27, %26 : vector<128x512xf32>
    %29 = arith.mulf %16, %28 : vector<128x512xf32>
    %30 = arith.truncf %29 : vector<128x512xf32> to vector<128x512xbf16>
    %c0_12 = arith.constant 0 : index
    %c0_13 = arith.constant 0 : index
    %31 = vector.load %arg4[%c0_12, %c0_13] : memref<512x128xbf16, #tpu.memory_space<vmem>>, vector<512x128xbf16>
    %cst_14 = arith.constant dense<0.000000e+00> : vector<128x128xf32>
    %32 = tpu.matmul %30, %31, %cst_14 {dimension_numbers = #tpu.dot_dimension_numbers<[1], [0], [0], [1], [0, 0, 1, 1], [], []>} : vector<128x512xbf16>, vector<512x128xbf16>, vector<128x128xf32> -> vector<128x128xf32>
    %c0_15 = arith.constant 0 : index
    %c0_16 = arith.constant 0 : index
    %33 = vector.load %arg5[%c0_15, %c0_16] : memref<1x128xf32, #tpu.memory_space<vmem>>, vector<1x128xf32>
    %34 = vector.broadcast %33 : vector<1x128xf32> to vector<128x128xf32>
    %35 = arith.addf %32, %34 : vector<128x128xf32>
    %36 = arith.addf %35, %0 : vector<128x128xf32>
    %c0_17 = arith.constant 0 : index
    %c0_18 = arith.constant 0 : index
    %37 = vector.load %arg6[%c0_17, %c0_18] : memref<128x128xf32, #tpu.memory_space<vmem>>, vector<128x128xf32>
    tpu.vector_store %arg6[%c0_17, %c0_18], %36 {strides = array<i32>} : memref<128x128xf32, #tpu.memory_space<vmem>>, vector<128x128xf32>,
    return
  }
  func.func @transform_0(%arg0: i32) -> (i32, i32) {
    %c0_i32 = arith.constant 0 : i32
    %c0_i32_0 = arith.constant 0 : i32
    return %arg0, %c0_i32 : i32, i32
  }
  func.func @transform_1(%arg0: i32) -> (i32, i32) {
    %c0_i32 = arith.constant 0 : i32
    %c0_i32_0 = arith.constant 0 : i32
    %c0_i32_1 = arith.constant 0 : i32
    return %c0_i32, %c0_i32_0 : i32, i32
  }
  func.func @transform_2(%arg0: i32) -> (i32, i32) {
    %c0_i32 = arith.constant 0 : i32
    %c0_i32_0 = arith.constant 0 : i32
    %c0_i32_1 = arith.constant 0 : i32
    return %c0_i32, %c0_i32_0 : i32, i32
  }
  func.func @transform_3(%arg0: i32) -> (i32, i32) {
    %c0_i32 = arith.constant 0 : i32
    %c0_i32_0 = arith.constant 0 : i32
    %c0_i32_1 = arith.constant 0 : i32
    return %c0_i32, %c0_i32_0 : i32, i32
  }
  func.func @transform_4(%arg0: i32) -> (i32, i32) {
    %c0_i32 = arith.constant 0 : i32
    %c0_i32_0 = arith.constant 0 : i32
    %c0_i32_1 = arith.constant 0 : i32
    return %c0_i32, %c0_i32_0 : i32, i32
  }
  func.func @transform_5(%arg0: i32) -> (i32, i32) {
    %c0_i32 = arith.constant 0 : i32
    %c0_i32_0 = arith.constant 0 : i32
    return %arg0, %c0_i32 : i32, i32
  }
}

</mosaic_0001>

<bundles_post_ra>
// kernel: prenorm_residual.1
= control target key start
LH: loop header
LB: loop body
LE: loop exit
PB: predicated region body
PF: predicated region fallthrough
CT: control target
= control target key end

     0   :  { %s3497_s0 = inlined_call_operand.vmem [shape: f32[128,128], index: 0, kind: input, shape index: {}, may-alias: {0,5}]   ;;  %s3498_s1 = inlined_call_operand.vmem [shape: bf16[128,512], index: 1, kind: input, shape index: {}]   ;;  %s3499_s3 = inlined_call_operand.vmem [shape: bf16[512,128], index: 3, kind: input, shape index: {}]   ;;  %s3500_s2 = inlined_call_operand.vmem [shape: f32[1,512], index: 2, kind: input, shape index: {}]   ;;  %s3501_s4 = inlined_call_operand.vmem [shape: f32[1,128], index: 4, kind: input, shape index: {}]   ;;  %s3502_s5 = inlined_call_operand.vmem [shape: f32[128,128], index: 5, kind: output, shape index: {}, may-alias: {0,5}]  }
   0x1   :  { %v2182_v0 = vld [vmem:[%s3497_s0] sm:$0xff]  ;;  %v2187_v1 = vld [vmem:[%s3497_s0 + $0x10] sm:$0xff]  ;;  %v2192_v2 = vld [vmem:[%s3497_s0 + $0x8] sm:$0xff] }
   0x2   :  { %v37_v3 = vmul.f32 %v2182_v0, %v2182_v0  ;;  %v39_v4 = vmul.f32 %v2187_v1, %v2187_v1  ;;  %v2201_v5 = vld [vmem:[%s3497_s0 + $0x18] sm:$0xff]  ;;  %v38_v6 = vmul.f32 %v2192_v2, %v2192_v2  ;;  %v2210_v8 = vld [vmem:[%s3497_s0 + $0x28] sm:$0xff]  ;;  %v2215_v9 = vld [vmem:[%s3497_s0 + $0x20] sm:$0xff] }
   0x3   :  { %v40_v7 = vmul.f32 %v2201_v5, %v2201_v5  ;;  %v2220_v10 = vld [vmem:[%s3497_s0 + $0x38] sm:$0xff]  ;;  %v2225_v11 = vld [vmem:[%s3497_s0 + $0x30] sm:$0xff]  ;;  %v42_v13 = vmul.f32 %v2210_v8, %v2210_v8  ;;  %v41_v14 = vmul.f32 %v2215_v9, %v2215_v9  ;;  %v2252_v20 = vld [vmem:[%s3497_s0 + $0x48] sm:$0xff] }
   0x4   :  { %53 = vadd.xlane.f32.xlu0 %v37_v3  ;;  %57 = vadd.xlane.f32.xlu1 %v39_v4  ;;  %v1892_v12 = vld [vmem:[%s3498_s1 + $0x4] ss:$16 sps:$4 sm:$0xff]   ;;  %v1894_v15 = vld [vmem:[%s3498_s1 + $0xc] ss:$16 sps:$4 sm:$0xff]   ;;  %v1896_v16 = vld [vmem:[%s3498_s1] ss:$16 sps:$4 sm:$0xff]   ;;  %v44_v24 = vmul.f32 %v2220_v10, %v2220_v10  ;;  %v43_v25 = vmul.f32 %v2225_v11, %v2225_v11  ;;  %v46_v30 = vmul.f32 %v2252_v20, %v2252_v20 }
   0x5   :  { %v1897_v17 = vld [vmem:[%s3498_s1 + $0x8] ss:$16 sps:$4 sm:$0xff]   ;;  %371 = vmatprep.subr.bf16.mxu0 %v1892_v12  ;;  %v1898_v18 = vld [vmem:[%s3498_s1 + $0x24] ss:$16 sps:$4 sm:$0xff]   ;;  %484 = vmatprep.subr.bf16.mxu1 %v1894_v15  ;;  %v1900_v19 = vld [vmem:[%s3498_s1 + $0x2c] ss:$16 sps:$4 sm:$0xff]  }
   0x6   :  { %372 = vmatpush1.bf16.msra.mxu0 %v1896_v16  ;;  %v2257_v21 = vld [vmem:[%s3497_s0 + $0x40] sm:$0xff]  ;;  %485 = vmatpush1.bf16.msra.mxu1 %v1897_v17  ;;  %v1903_v23 = vld [vmem:[%s3498_s1 + $0x28] ss:$16 sps:$4 sm:$0xff]   ;;  %v1906_v27 = vld [vmem:[%s3498_s1 + $0x4c] ss:$16 sps:$4 sm:$0xff]   ;;  %v2148_v3 = vmov 0  }
   0x7   :  { %373 = vmatprep.subr.bf16.mxu0 %v1898_v18  ;;  %v1902_v22 = vld [vmem:[%s3498_s1 + $0x20] ss:$16 sps:$4 sm:$0xff]   ;;  %v1904_v26 = vld [vmem:[%s3498_s1 + $0x44] ss:$16 sps:$4 sm:$0xff]   ;;  %486 = vmatprep.subr.bf16.mxu1 %v1900_v19  ;;  %v2278_v28 = vld [vmem:[%s3497_s0 + $0x58] sm:$0xff]  ;;  %v45_v31 = vmul.f32 %v2257_v21, %v2257_v21 }
   0x8   :  { %55 = vadd.xlane.f32.xlu0 %v38_v6  ;;  %59 = vadd.xlane.f32.xlu1 %v40_v7  ;;  %v2283_v29 = vld [vmem:[%s3497_s0 + $0x50] sm:$0xff]  ;;  %v1909_v33 = vld [vmem:[%s3498_s1 + $0x48] ss:$16 sps:$4 sm:$0xff]   ;;  %v2303_v35 = vld [vmem:[%s3497_s0 + $0x60] sm:$0xff]  ;;  %v48_v38 = vmul.f32 %v2278_v28, %v2278_v28 }
   0x9   :  { %v1908_v32 = vld [vmem:[%s3498_s1 + $0x40] ss:$16 sps:$4 sm:$0xff]   ;;  %v2298_v34 = vld [vmem:[%s3497_s0 + $0x68] sm:$0xff]  ;;  %v1910_v36 = vld [vmem:[%s3498_s1 + $0x64] ss:$16 sps:$4 sm:$0xff]   ;;  %v47_v39 = vmul.f32 %v2283_v29, %v2283_v29  ;;  %v49_v45 = vmul.f32 %v2303_v35, %v2303_v35  ;;  %403 = vmatprep.mubr.bf16.mxu0 %v2148_v3  ;;  %516 = vmatprep.mubr.bf16.mxu1 %v2148_v3 }
   0xa   :  { %374 = vmatpush1.bf16.msra.mxu0 %v1902_v22  ;;  %487 = vmatpush1.bf16.msra.mxu1 %v1903_v23  ;;  %v1912_v37 = vld [vmem:[%s3498_s1 + $0x6c] ss:$16 sps:$4 sm:$0xff]   ;;  %v1914_v40 = vld [vmem:[%s3498_s1 + $0x60] ss:$16 sps:$4 sm:$0xff]   ;;  %v1915_v41 = vld [vmem:[%s3498_s1 + $0x68] ss:$16 sps:$4 sm:$0xff]   ;;  %v50_v44 = vmul.f32 %v2298_v34, %v2298_v34 }
   0xb   :  { %375 = vmatprep.subr.bf16.mxu0 %v1904_v26  ;;  %488 = vmatprep.subr.bf16.mxu1 %v1906_v27  ;;  %v1916_v42 = vld [vmem:[%s3498_s1 + $0x84] ss:$16 sps:$4 sm:$0xff]   ;;  %v1918_v43 = vld [vmem:[%s3498_s1 + $0x8c] ss:$16 sps:$4 sm:$0xff]   ;;  %v1920_v46 = vld [vmem:[%s3498_s1 + $0x80] ss:$16 sps:$4 sm:$0xff]  }
   0xc   :  { %63 = vadd.xlane.f32.xlu1 %v42_v13  ;;  %61 = vadd.xlane.f32.xlu0 %v41_v14  ;;  %v1921_v47 = vld [vmem:[%s3498_s1 + $0x88] ss:$16 sps:$4 sm:$0xff]   ;;  %v2345_v49 = vld [vmem:[%s3497_s0 + $0x70] sm:$0xff]  ;;  %v1924_v51 = vld [vmem:[%s3498_s1 + $0xac] ss:$16 sps:$4 sm:$0xff]  }
   0xd   :  { %v2340_v48 = vld [vmem:[%s3497_s0 + $0x78] sm:$0xff]  ;;  %v1922_v50 = vld [vmem:[%s3498_s1 + $0xa4] ss:$16 sps:$4 sm:$0xff]   ;;  %v51_v53 = vmul.f32 %v2345_v49, %v2345_v49  ;;  %v1926_v54 = vld [vmem:[%s3498_s1 + $0xa0] ss:$16 sps:$4 sm:$0xff]  }
   0xe   :  { %376 = vmatpush1.bf16.msra.mxu0 %v1908_v32  ;;  %489 = vmatpush1.bf16.msra.mxu1 %v1909_v33  ;;  %v52_v52 = vmul.f32 %v2340_v48, %v2340_v48  ;;  %v1927_v55 = vld [vmem:[%s3498_s1 + $0xa8] ss:$16 sps:$4 sm:$0xff]   ;;  %v1928_v56 = vld [vmem:[%s3498_s1 + $0xc4] ss:$16 sps:$4 sm:$0xff]   ;;  %v1930_v57 = vld [vmem:[%s3498_s1 + $0xcc] ss:$16 sps:$4 sm:$0xff]  }
   0xf   :  { %377 = vmatprep.subr.bf16.mxu0 %v1910_v36  ;;  %490 = vmatprep.subr.bf16.mxu1 %v1912_v37  ;;  %v1932_v58 = vld [vmem:[%s3498_s1 + $0xc0] ss:$16 sps:$4 sm:$0xff]   ;;  %v1933_v59 = vld [vmem:[%s3498_s1 + $0xc8] ss:$16 sps:$4 sm:$0xff]   ;;  %v1934_v60 = vld [vmem:[%s3498_s1 + $0xe4] ss:$16 sps:$4 sm:$0xff]  }
  0x10   :  { %67 = vadd.xlane.f32.xlu1 %v44_v24  ;;  %65 = vadd.xlane.f32.xlu0 %v43_v25  ;;  %v1936_v61 = vld [vmem:[%s3498_s1 + $0xec] ss:$16 sps:$4 sm:$0xff]   ;;  %v1938_v62 = vld [vmem:[%s3498_s1 + $0xe0] ss:$16 sps:$4 sm:$0xff]   ;;  %v1939_v63 = vld [vmem:[%s3498_s1 + $0xe8] ss:$16 sps:$4 sm:$0xff]  }
  0x11   :  { %v1940_v4 = vld [vmem:[%s3499_s3 + $0x40] sm:$0xff]  }
  0x12   :  { %378 = vmatpush1.bf16.msra.mxu0 %v1914_v40  ;;  %491 = vmatpush1.bf16.msra.mxu1 %v1915_v41  ;;  %v1942_v6 = vld [vmem:[%s3499_s3 + $0xc0] sm:$0xff]  }
  0x13   :  { %379 = vmatprep.subr.bf16.mxu0 %v1916_v42  ;;  %492 = vmatprep.subr.bf16.mxu1 %v1918_v43 }
  0x14   :  { %71 = vadd.xlane.f32.xlu1 %v46_v30  ;;  %69 = vadd.xlane.f32.xlu0 %v45_v31 }
  0x16   :  { %380 = vmatpush1.bf16.msra.mxu0 %v1920_v46  ;;  %493 = vmatpush1.bf16.msra.mxu1 %v1921_v47 }
  0x17   :  { %381 = vmatprep.subr.bf16.mxu0 %v1922_v50  ;;  %494 = vmatprep.subr.bf16.mxu1 %v1924_v51 }
  0x18   :  { %75 = vadd.xlane.f32.xlu1 %v48_v38  ;;  %73 = vadd.xlane.f32.xlu0 %v47_v39 }
  0x1a   :  { %382 = vmatpush1.bf16.msra.mxu0 %v1926_v54  ;;  %495 = vmatpush1.bf16.msra.mxu1 %v1927_v55  ;;  %v1945_v55 = vld [vmem:[%s3499_s3 + $0x8] sm:$0xff]  }
  0x1b   :  { %383 = vmatprep.subr.bf16.mxu0 %v1928_v56  ;;  %496 = vmatprep.subr.bf16.mxu1 %v1930_v57  ;;  %v1947_v56 = vld [vmem:[%s3499_s3 + $0x88] sm:$0xff]  }
  0x1c   :  { %79 = vadd.xlane.f32.xlu1 %v50_v44  ;;  %77 = vadd.xlane.f32.xlu0 %v49_v45  ;;  %v1941_v44 = vld [vmem:[%s3499_s3] sm:$0xff]  }
  0x1d   :  { %v1943_v45 = vld [vmem:[%s3499_s3 + $0x80] sm:$0xff]  }
  0x1e   :  { %384 = vmatpush1.bf16.msra.mxu0 %v1932_v58  ;;  %497 = vmatpush1.bf16.msra.mxu1 %v1933_v59 }
  0x1f   :  { %385 = vmatprep.subr.bf16.mxu0 %v1934_v60  ;;  %498 = vmatprep.subr.bf16.mxu1 %v1936_v61  ;;  %v1949_v61 = vld [vmem:[%s3499_s3 + $0x10] sm:$0xff]  }
  0x20   :  { %83 = vadd.xlane.f32.xlu1 %v52_v52  ;;  %81 = vadd.xlane.f32.xlu0 %v51_v53 }
  0x22   :  { %386 = vmatpush1.bf16.msra.mxu0 %v1938_v62  ;;  %499 = vmatpush1.bf16.msra.mxu1 %v1939_v63  ;;  %v1951_v62 = vld [vmem:[%s3499_s3 + $0x90] sm:$0xff]  }
  0x23   :  { %1763 = vmatprep.subr.bf16.mxu0 %v1940_v4  ;;  %1827 = vmatprep.subr.bf16.mxu1 %v1942_v6  ;;  %v1952_v4 = vld [vmem:[%s3499_s3 + $0x58] sm:$0xff]  }
  0x24   :  { %v1954_v6 = vld [vmem:[%s3499_s3 + $0xd8] sm:$0xff]  }
  0x91   :  { %v54_v7 = vpop.xlane.xlu0 %53  ;;  %v58_v12 = vpop.xlane.xlu1 %57 }
  0x92   :  { %v85_v13 = vmax.f32 %v54_v7, 1e-24  ;;  %v87_v14 = vmax.f32 %v58_v12, 1e-24 }
  0x94   :  { %1972 = vrsqrt.f32 %v85_v13 }
  0x95   :  { %v56_v15 = vpop.xlane.xlu0 %55  ;;  %v60_v16 = vpop.xlane.xlu1 %59 }
  0x96   :  { %v86_v17 = vmax.f32 %v56_v15, 1e-24  ;;  %v88_v18 = vmax.f32 %v60_v16, 1e-24 }
  0x98   :  { %1974 = vrsqrt.f32 %v86_v17  ;;  %v1953_v17 = vld [vmem:[%s3499_s3 + $0x18] sm:$0xff]  }
  0x99   :  { %1976 = vrsqrt.f32 %v87_v14  ;;  %v64_v19 = vpop.xlane.xlu1 %63  ;;  %v62_v22 = vpop.xlane.xlu0 %61 }
  0x9a   :  { %1978 = vrsqrt.f32 %v88_v18  ;;  %v90_v23 = vmax.f32 %v64_v19, 1e-24  ;;  %v89_v24 = vmax.f32 %v62_v22, 1e-24 }
  0x9c   :  { %1980 = vrsqrt.f32 %v90_v23 }
  0x9d   :  { %1982 = vrsqrt.f32 %v89_v24  ;;  %v68_v26 = vpop.xlane.xlu1 %67  ;;  %v66_v30 = vpop.xlane.xlu0 %65 }
  0x9e   :  { %v1973_v25 = vpop.eup %1972  ;;  %v92_v36 = vmax.f32 %v68_v26, 1e-24  ;;  %v91_v38 = vmax.f32 %v66_v30, 1e-24 }
  0x9f   :  { %v117_v27 = vmul.f32 11.313708, %v1973_v25 }
  0xa0   :  { %1984 = vrsqrt.f32 %v92_v36 }
  0xa1   :  { %v133_v39 = vmul.f32 %v117_v27, %v2182_v0  ;;  %1986 = vrsqrt.f32 %v91_v38  ;;  %v72_v46 = vpop.xlane.xlu1 %71  ;;  %v1944_v0 = vld [vmem:[%s3499_s3 + $0x48] sm:$0xff]   ;;  %v70_v50 = vpop.xlane.xlu0 %69 }
  0xa2   :  { %v1975_v31 = vpop.eup %1974  ;;  %v94_v54 = vmax.f32 %v72_v46, 1e-24  ;;  %v93_v57 = vmax.f32 %v70_v50, 1e-24 }
  0xa3   :  { %v1977_v32 = vpop.eup %1976  ;;  %v118_v33 = vmul.f32 11.313708, %v1975_v31 }
  0xa4   :  { %v1979_v37 = vpop.eup %1978  ;;  %v119_v41 = vmul.f32 11.313708, %v1977_v32  ;;  %1988 = vrsqrt.f32 %v94_v54 }
  0xa5   :  { %v134_v40 = vmul.f32 %v118_v33, %v2192_v2  ;;  %v120_v42 = vmul.f32 11.313708, %v1979_v37  ;;  %v1946_v2 = vld [vmem:[%s3499_s3 + $0xc8] sm:$0xff]   ;;  %1990 = vrsqrt.f32 %v93_v57  ;;  %v76_v63 = vpop.xlane.xlu1 %75  ;;  %v74_v14 = vpop.xlane.xlu0 %73 }
  0xa6   :  { %v1981_v47 = vpop.eup %1980  ;;  %v135_v52 = vmul.f32 %v119_v41, %v2187_v1  ;;  %v1948_v1 = vld [vmem:[%s3499_s3 + $0x50] sm:$0xff]   ;;  %v96_v16 = vmax.f32 %v76_v63, 1e-24 }
  0xa7   :  { %v149_v43 = vpack.c.bf16 %v134_v40, %v133_v39  ;;  %v1983_v51 = vpop.eup %1982  ;;  %v136_v53 = vmul.f32 %v120_v42, %v2201_v5  ;;  %v1950_v5 = vld [vmem:[%s3499_s3 + $0xd0] sm:$0xff]   ;;  %v122_v58 = vmul.f32 11.313708, %v1981_v47 }
  0xa8   :  { %v121_v59 = vmul.f32 11.313708, %v1983_v51  ;;  %1992 = vrsqrt.f32 %v96_v16  ;;  %v1965_v63 = vld [vmem:[%s3499_s3 + $0x30] sm:$0xff]  }
  0xa9   :  { %404 = vmatmul.mubr.bf16.vlgmr.msra.gmra.mrb[0].mxu0 %v149_v43  ;;  %517 = vmatmul.mubr.bf16.vlgmr.msra.gmra.mrb[0].mxu1 %v149_v43  ;;  %v150_v60 = vpack.c.bf16 %v136_v53, %v135_v52  ;;  %v138_v12 = vmul.f32 %v122_v58, %v2210_v8  ;;  %v1955_v8 = vld [vmem:[%s3499_s3 + $0x98] sm:$0xff]   ;;  %v80_v23 = vpop.xlane.xlu1 %79  ;;  %v78_v27 = vpop.xlane.xlu0 %77  ;;  %v1962_v58 = vld [vmem:[%s3499_s3 + $0xe8] sm:$0xff]  }
  0xaa   :  { %413 = vmatprep.mubr.bf16.mxu0 %v2148_v3  ;;  %526 = vmatprep.mubr.bf16.mxu1 %v2148_v3  ;;  %v1985_v7 = vpop.eup %1984  ;;  %v137_v13 = vmul.f32 %v121_v59, %v2215_v9  ;;  %v95_v9 = vmax.f32 %v74_v14, 1e-24  ;;  %v98_v31 = vmax.f32 %v80_v23, 1e-24  ;;  %v97_v32 = vmax.f32 %v78_v27, 1e-24 }
  0xab   :  { %1764 = vmatpush3.bf16.msra.mxu0 %v1941_v44  ;;  %1828 = vmatpush3.bf16.msra.mxu1 %v1943_v45  ;;  %v1987_v15 = vpop.eup %1986  ;;  %v124_v18 = vmul.f32 11.313708, %v1985_v7  ;;  %v1961_v59 = vld [vmem:[%s3499_s3 + $0x28] sm:$0xff]   ;;  %v1970_v7 = vld [vmem:[%s3499_s3 + $0xf8] sm:$0xff]   ;;  %v191_v14 = vlaneseq }
  0xac   :  { %1765 = vmatprep.subr.bf16.mxu0 %v1944_v0  ;;  %1829 = vmatprep.subr.bf16.mxu1 %v1946_v2  ;;  %v123_v19 = vmul.f32 11.313708, %v1987_v15  ;;  %v151_v22 = vpack.c.bf16 %v138_v12, %v137_v13  ;;  %1994 = vrsqrt.f32 %v95_v9  ;;  %v1969_v12 = vld [vmem:[%s3499_s3 + $0x38] sm:$0xff]  }
  0xad   :  { %v140_v25 = vmul.f32 %v124_v18, %v2220_v10  ;;  %1996 = vrsqrt.f32 %v98_v31  ;;  %v84_v38 = vpop.xlane.xlu1 %83  ;;  %v82_v40 = vpop.xlane.xlu0 %81  ;;  %v1971_v13 = vld [vmem:[%s3499_s3 + $0xb8] sm:$0xff]   ;;  %v192_v15 = vshrl.u32 %v191_v14, 7 }
  0xae   :  { %v1989_v24 = vpop.eup %1988  ;;  %v139_v26 = vmul.f32 %v123_v19, %v2225_v11  ;;  %1998 = vrsqrt.f32 %v97_v32  ;;  %v100_v42 = vmax.f32 %v84_v38, 1e-24  ;;  %v99_v43 = vmax.f32 %v82_v40, 1e-24 }
  0xaf   :  { %1766 = vmatpush3.bf16.msra.mxu0 %v1945_v55  ;;  %1830 = vmatpush3.bf16.msra.mxu1 %v1947_v56  ;;  %v1991_v30 = vpop.eup %1990  ;;  %v126_v33 = vmul.f32 11.313708, %v1989_v24  ;;  %v193_v16 = vsub.s32 0, %v192_v15  ;;  %v197_v9 = vsub.s32 1, %v192_v15  ;;  %v205_v18 = vsub.s32 3, %v192_v15 }
  0xb0   :  { %1767 = vmatprep.subr.bf16.mxu0 %v1948_v1  ;;  %1831 = vmatprep.subr.bf16.mxu1 %v1950_v5  ;;  %v125_v36 = vmul.f32 11.313708, %v1991_v30  ;;  %v152_v37 = vpack.c.bf16 %v140_v25, %v139_v26  ;;  %2000 = vrsqrt.f32 %v100_v42  ;;  %v1958_v5 = vld [vmem:[%s3499_s3 + $0xe0] sm:$0xff]  }
  0xb1   :  { %414 = vmatmul.mubr.bf16.gmra.mrb[4].mxu0 %v150_v60  ;;  %527 = vmatmul.mubr.bf16.gmra.mrb[4].mxu1 %v150_v60  ;;  %v142_v10 = vmul.f32 %v126_v33, %v2252_v20  ;;  %2002 = vrsqrt.f32 %v99_v43  ;;  %v1963_v60 = vld [vmem:[%s3499_s3 + $0xa8] sm:$0xff]  }
  0xb2   :  { %423 = vmatprep.mubr.bf16.mxu0 %v2148_v3  ;;  %536 = vmatprep.mubr.bf16.mxu1 %v2148_v3  ;;  %v1993_v39 = vpop.eup %1992  ;;  %v141_v11 = vmul.f32 %v125_v36, %v2257_v21 }
  0xb3   :  { %1768 = vmatpush3.bf16.msra.mxu0 %v1949_v61  ;;  %1832 = vmatpush3.bf16.msra.mxu1 %v1951_v62  ;;  %v128_v44 = vmul.f32 11.313708, %v1993_v39  ;;  %v1964_v61 = vld [vmem:[%s3499_s3 + $0x70] sm:$0xff]  }
  0xb4   :  { %1769 = vmatprep.subr.bf16.mxu0 %v1952_v4  ;;  %1833 = vmatprep.subr.bf16.mxu1 %v1954_v6  ;;  %v153_v46 = vpack.c.bf16 %v142_v10, %v141_v11  ;;  %v1966_v62 = vld [vmem:[%s3499_s3 + $0xf0] sm:$0xff]   ;;  %v1968_v6 = vld [vmem:[%s3499_s3 + $0x78] sm:$0xff]  }
  0xb5   :  { %v144_v20 = vmul.f32 %v128_v44, %v2278_v28  ;;  %v1967_v4 = vld [vmem:[%s3499_s3 + $0xb0] sm:$0xff]  }
  0xb6   :  { %v1995_v41 = vpop.eup %1994 }
  0xb7   :  { %1770 = vmatpush3.bf16.msra.mxu0 %v1953_v17  ;;  %1834 = vmatpush3.bf16.msra.mxu1 %v1955_v8  ;;  %v127_v45 = vmul.f32 11.313708, %v1995_v41  ;;  %v1997_v0 = vpop.eup %1996  ;;  %v201_v17 = vsub.s32 2, %v192_v15  ;;  %v189_v8 = vld [vmem:[%s3500_s2] sm:$0xf] }
  0xb8   :  { %v1999_v2 = vpop.eup %1998  ;;  %v130_v47 = vmul.f32 11.313708, %v1997_v0  ;;  %1835 = vmatprep.subr.bf16.mxu1 %v1958_v5  ;;  %v2518_v19 = vrot.slane %v189_v8, %v193_v16  ;;  %v2522_v23 = vrot.slane %v189_v8, %v197_v9  ;;  %v2524_v24 = vrot.slane %v189_v8, %v205_v18 }
  0xb9   :  { %424 = vmatmul.mubr.bf16.gmra.mrb[8].mxu0 %v151_v22  ;;  %537 = vmatmul.mubr.bf16.gmra.mrb[8].mxu1 %v151_v22  ;;  %v143_v21 = vmul.f32 %v127_v45, %v2283_v29  ;;  %v129_v50 = vmul.f32 11.313708, %v1999_v2  ;;  %v2520_v22 = vrot.slane %v189_v8, %v201_v17 }
  0xba   :  { %433 = vmatprep.mubr.bf16.mxu0 %v2148_v3  ;;  %546 = vmatprep.mubr.bf16.mxu1 %v2148_v3  ;;  %v2001_v52 = vpop.eup %2000  ;;  %v146_v53 = vmul.f32 %v130_v47, %v2298_v34 }
  0xbb   :  { %v154_v51 = vpack.c.bf16 %v144_v20, %v143_v21  ;;  %v145_v54 = vmul.f32 %v129_v50, %v2303_v35  ;;  %v2003_v28 = vpop.eup %2002  ;;  %v132_v29 = vmul.f32 11.313708, %v2001_v52  ;;  %v1956_v35 = vld [vmem:[%s3499_s3 + $0x60] sm:$0xff]  }
  0xbc   :  { %v131_v55 = vmul.f32 11.313708, %v2003_v28  ;;  %1771 = vmatprep.subr.bf16.mxu0 %v1956_v35 }
  0xbd   :  { %v155_v56 = vpack.c.bf16 %v146_v53, %v145_v54  ;;  %v148_v57 = vmul.f32 %v132_v29, %v2340_v48  ;;  %v1957_v48 = vld [vmem:[%s3499_s3 + $0x20] sm:$0xff]  }
  0xbe   :  { %v147_v1 = vmul.f32 %v131_v55, %v2345_v49  ;;  %v1959_v49 = vld [vmem:[%s3499_s3 + $0xa0] sm:$0xff]   ;;  %1772 = vmatpush3.bf16.msra.mxu0 %v1957_v48 }
  0xbf   :  { %1836 = vmatpush3.bf16.msra.mxu1 %v1959_v49 }
  0xc0   :  { %v156_v34 = vpack.c.bf16 %v148_v57, %v147_v1  ;;  %1837 = vmatprep.subr.bf16.mxu1 %v1962_v58 }
  0xc1   :  { %434 = vmatmul.mubr.bf16.gmra.mrb[12].mxu0 %v152_v37  ;;  %547 = vmatmul.mubr.bf16.gmra.mrb[12].mxu1 %v152_v37 }
  0xc2   :  { %443 = vmatprep.mubr.bf16.mxu0 %v2148_v3  ;;  %556 = vmatprep.mubr.bf16.mxu1 %v2148_v3 }
  0xc3   :  { %1838 = vmatpush3.bf16.msra.mxu1 %v1963_v60 }
  0xc4   :  { %1839 = vmatprep.subr.bf16.mxu1 %v1966_v62 }
  0xc7   :  { %1840 = vmatpush3.bf16.msra.mxu1 %v1967_v4 }
  0xc8   :  { %1841 = vmatprep.subr.bf16.mxu1 %v1970_v7 }
  0xc9   :  { %444 = vmatmul.mubr.bf16.gmra.mrb[16].mxu0 %v153_v46  ;;  %557 = vmatmul.mubr.bf16.gmra.mrb[16].mxu1 %v153_v46 }
  0xca   :  { %453 = vmatprep.mubr.bf16.mxu0 %v2148_v3  ;;  %566 = vmatprep.mubr.bf16.mxu1 %v2148_v3 }
  0xcb   :  { %1842 = vmatpush3.bf16.msra.mxu1 %v1971_v13 }
  0xd1   :  { %454 = vmatmul.mubr.bf16.gmra.mrb[20].mxu0 %v154_v51  ;;  %567 = vmatmul.mubr.bf16.gmra.mrb[20].mxu1 %v154_v51 }
  0xd2   :  { %463 = vmatprep.mubr.bf16.mxu0 %v2148_v3  ;;  %576 = vmatprep.mubr.bf16.mxu1 %v2148_v3 }
  0xd9   :  { %464 = vmatmul.mubr.bf16.gmra.mrb[24].mxu0 %v155_v56  ;;  %577 = vmatmul.mubr.bf16.gmra.mrb[24].mxu1 %v155_v56 }
  0xda   :  { %473 = vmatprep.mubr.bf16.mxu0 %v2148_v3  ;;  %586 = vmatprep.mubr.bf16.mxu1 %v2148_v3  ;;  %v1960_v3 = vld [vmem:[%s3499_s3 + $0x68] sm:$0xff]  }
  0xdb   :  { %1773 = vmatprep.subr.bf16.mxu0 %v1960_v3 }
  0xdc   :  { %1774 = vmatpush3.bf16.msra.mxu0 %v1961_v59 }
  0xdd   :  { %1775 = vmatprep.subr.bf16.mxu0 %v1964_v61 }
  0xe0   :  { %1776 = vmatpush3.bf16.msra.mxu0 %v1965_v63 }
  0xe1   :  { %474 = vmatmul.mubr.bf16.gmra.mrb[28].mxu0 %v156_v34  ;;  %587 = vmatmul.mubr.bf16.gmra.mrb[28].mxu1 %v156_v34 }
  0xe2   :  { %1777 = vmatprep.subr.bf16.mxu0 %v1968_v6 }
  0xe4   :  { %1778 = vmatpush3.bf16.msra.mxu0 %v1969_v12 }
 0x17c   :  { %v405_v25 = vpop.f32.mrb[0].mxu0  ;;  %v518_v26 = vpop.f32.mrb[0].mxu1 }
 0x17d   :  { %v2527_v27 = vadd.f32 %v405_v25, %v2518_v19  ;;  %v2530_v30 = vadd.f32 %v518_v26, %v2520_v22  ;;  %v407_v31 = vpop.f32.mrb[1].mxu0  ;;  %v520_v32 = vpop.f32.mrb[1].mxu1 }
 0x17e   :  { %v2533_v33 = vadd.f32 %v407_v31, %v2522_v23  ;;  %v2536_v36 = vadd.f32 %v520_v32, %v2524_v24  ;;  %v409_v37 = vpop.f32.mrb[2].mxu0  ;;  %v522_v38 = vpop.f32.mrb[2].mxu1 }
 0x17f   :  { %v597_v39 = vmul.f32 %v2527_v27, %v2527_v27  ;;  %v599_v10 = vmul.f32 %v2530_v30, %v2530_v30  ;;  %v2543_v11 = vadd.f32 %v409_v37, %v2518_v19  ;;  %v2546_v40 = vadd.f32 %v522_v38, %v2520_v22  ;;  %v411_v41 = vpop.f32.mrb[3].mxu0  ;;  %v524_v42 = vpop.f32.mrb[3].mxu1 }
 0x180   :  { %v598_v43 = vmul.f32 %v2533_v33, %v2533_v33  ;;  %v600_v44 = vmul.f32 %v2536_v36, %v2536_v36  ;;  %v2553_v45 = vadd.f32 %v411_v41, %v2522_v23  ;;  %v2556_v46 = vadd.f32 %v524_v42, %v2524_v24 }
 0x181   :  { %v661_v0 = vmul.f32 %v597_v39, %v2527_v27  ;;  %v663_v20 = vmul.f32 %v599_v10, %v2530_v30  ;;  %v601_v21 = vmul.f32 %v2543_v11, %v2543_v11  ;;  %v603_v2 = vmul.f32 %v2546_v40, %v2546_v40 }
 0x182   :  { %v662_v47 = vmul.f32 %v598_v43, %v2533_v33  ;;  %v664_v50 = vmul.f32 %v600_v44, %v2536_v36  ;;  %v602_v51 = vmul.f32 %v2553_v45, %v2553_v45  ;;  %v604_v52 = vmul.f32 %v2556_v46, %v2556_v46 }
 0x183   :  { %v725_v53 = vmul.f32 0.044715, %v661_v0  ;;  %v727_v54 = vmul.f32 0.044715, %v663_v20  ;;  %v665_v28 = vmul.f32 %v601_v21, %v2543_v11  ;;  %v667_v29 = vmul.f32 %v603_v2, %v2546_v40 }
 0x184   :  { %v726_v55 = vmul.f32 0.044715, %v662_v47  ;;  %v728_v56 = vmul.f32 0.044715, %v664_v50  ;;  %v666_v57 = vmul.f32 %v602_v51, %v2553_v45  ;;  %v668_v1 = vmul.f32 %v604_v52, %v2556_v46  ;;  %v415_v34 = vpop.f32.mrb[4].mxu0  ;;  %v528_v35 = vpop.f32.mrb[4].mxu1 }
 0x185   :  { %v789_v5 = vadd.f32 %v725_v53, %v2527_v27  ;;  %v791_v48 = vadd.f32 %v727_v54, %v2530_v30  ;;  %v729_v49 = vmul.f32 0.044715, %v665_v28  ;;  %v731_v3 = vmul.f32 0.044715, %v667_v29  ;;  %v417_v58 = vpop.f32.mrb[5].mxu0  ;;  %v530_v59 = vpop.f32.mrb[5].mxu1 }
 0x186   :  { %v790_v60 = vadd.f32 %v726_v55, %v2533_v33  ;;  %v792_v61 = vadd.f32 %v728_v56, %v2536_v36  ;;  %v730_v62 = vmul.f32 0.044715, %v666_v57  ;;  %v732_v63 = vmul.f32 0.044715, %v668_v1  ;;  %v419_v4 = vpop.f32.mrb[6].mxu0  ;;  %v532_v6 = vpop.f32.mrb[6].mxu1 }
 0x187   :  { %v853_v7 = vmul.f32 0.7978846, %v789_v5  ;;  %v855_v12 = vmul.f32 0.7978846, %v791_v48  ;;  %v793_v13 = vadd.f32 %v729_v49, %v2543_v11  ;;  %v795_v14 = vadd.f32 %v731_v3, %v2546_v40  ;;  %v421_v15 = vpop.f32.mrb[7].mxu0  ;;  %v534_v16 = vpop.f32.mrb[7].mxu1 }
 0x188   :  { %v854_v17 = vmul.f32 0.7978846, %v790_v60  ;;  %v856_v8 = vmul.f32 0.7978846, %v792_v61  ;;  %v794_v9 = vadd.f32 %v730_v62, %v2553_v45  ;;  %v796_v18 = vadd.f32 %v732_v63, %v2556_v46 }
 0x189   :  { %2004 = vtanh.f32 %v853_v7  ;;  %v857_v25 = vmul.f32 0.7978846, %v793_v13  ;;  %v859_v26 = vmul.f32 0.7978846, %v795_v14  ;;  %v2583_v31 = vadd.f32 %v415_v34, %v2518_v19 }
 0x18a   :  { %2006 = vtanh.f32 %v855_v12  ;;  %v858_v32 = vmul.f32 0.7978846, %v794_v9  ;;  %v860_v37 = vmul.f32 0.7978846, %v796_v18  ;;  %v2586_v38 = vadd.f32 %v528_v35, %v2520_v22 }
 0x18b   :  { %3542 = vst [vmem:[#allocation2_spill] sm:$0xff] %v2583_v31  ;;  %2008 = vtanh.f32 %v854_v17  ;;  %v605_v39 = vmul.f32 %v2583_v31, %v2583_v31  ;;  %v2591_v10 = vadd.f32 %v417_v58, %v2522_v23  ;;  %v2594_v41 = vadd.f32 %v530_v59, %v2524_v24 }
 0x18c   :  { %3543 = vst [vmem:[#allocation3_spill] sm:$0xff] %v2586_v38  ;;  %2010 = vtanh.f32 %v856_v8  ;;  %v607_v42 = vmul.f32 %v2586_v38, %v2586_v38  ;;  %v2599_v43 = vadd.f32 %v419_v4, %v2518_v19  ;;  %v2602_v44 = vadd.f32 %v532_v6, %v2520_v22  ;;  %v2604_v0 = vpop.f32.mrb[8].mxu0  ;;  %v2606_v20 = vpop.f32.mrb[8].mxu1 }
 0x18d   :  { %3544 = vst [vmem:[#allocation4_spill] sm:$0xff] %v2594_v41  ;;  %2012 = vtanh.f32 %v857_v25  ;;  %v669_v21 = vmul.f32 %v605_v39, %v2583_v31  ;;  %v606_v2 = vmul.f32 %v2591_v10, %v2591_v10  ;;  %v608_v47 = vmul.f32 %v2594_v41, %v2594_v41  ;;  %v2613_v50 = vpop.f32.mrb[9].mxu0  ;;  %v2615_v51 = vpop.f32.mrb[9].mxu1 }
 0x18e   :  { %3545 = vst [vmem:[#allocation5_spill] sm:$0xff] %v2599_v43  ;;  %3546 = vst [vmem:[#allocation6_spill] sm:$0xff] %v2602_v44  ;;  %2014 = vtanh.f32 %v859_v26  ;;  %v671_v52 = vmul.f32 %v607_v42, %v2586_v38  ;;  %v609_v53 = vmul.f32 %v2599_v43, %v2599_v43  ;;  %v611_v54 = vmul.f32 %v2602_v44, %v2602_v44  ;;  %v2622_v28 = vpop.f32.mrb[10].mxu0  ;;  %v2624_v29 = vpop.f32.mrb[10].mxu1 }
 0x18f   :  { %2016 = vtanh.f32 %v858_v32  ;;  %v733_v55 = vmul.f32 0.044715, %v669_v21  ;;  %v670_v56 = vmul.f32 %v606_v2, %v2591_v10  ;;  %v672_v57 = vmul.f32 %v608_v47, %v2594_v41  ;;  %v2628_v1 = vpop.f32.mrb[11].mxu0  ;;  %v2630_v34 = vpop.f32.mrb[11].mxu1 }
 0x190   :  { %2018 = vtanh.f32 %v860_v37  ;;  %v735_v35 = vmul.f32 0.044715, %v671_v52  ;;  %v673_v5 = vmul.f32 %v609_v53, %v2599_v43  ;;  %v675_v48 = vmul.f32 %v611_v54, %v2602_v44 }
 0x191   :  { %v797_v49 = vadd.f32 %v733_v55, %v2583_v31  ;;  %v734_v3 = vmul.f32 0.044715, %v670_v56  ;;  %v736_v58 = vmul.f32 0.044715, %v672_v57  ;;  %v2636_v59 = vadd.f32 %v421_v15, %v2522_v23 }
 0x192   :  { %v799_v60 = vadd.f32 %v735_v35, %v2586_v38  ;;  %v737_v61 = vmul.f32 0.044715, %v673_v5  ;;  %v739_v62 = vmul.f32 0.044715, %v675_v48  ;;  %v2640_v63 = vadd.f32 %v534_v16, %v2524_v24 }
 0x193   :  { %3547 = vst [vmem:[#allocation7_spill] sm:$0xff] %v2636_v59  ;;  %v2005_v4 = vpop.eup %2004  ;;  %v861_v6 = vmul.f32 0.7978846, %v797_v49  ;;  %v798_v7 = vadd.f32 %v734_v3, %v2591_v10  ;;  %v800_v12 = vadd.f32 %v736_v58, %v2594_v41  ;;  %v610_v13 = vmul.f32 %v2636_v59, %v2636_v59 }
 0x194   :  { %3548 = vst [vmem:[#allocation8_spill] sm:$0xff] %v2640_v63  ;;  %v2007_v14 = vpop.eup %2006  ;;  %v981_v17 = vadd.f32 1.0, %v2005_v4  ;;  %v863_v15 = vmul.f32 0.7978846, %v799_v60  ;;  %v801_v8 = vadd.f32 %v737_v61, %v2599_v43  ;;  %v803_v9 = vadd.f32 %v739_v62, %v2602_v44  ;;  %v2648_v18 = vpop.f32.mrb[12].mxu0 }
 0x195   :  { %v2650_v16 = vpop.f32.mrb[12].mxu1  ;;  %v2652_v25 = vpop.eup %2008  ;;  %v983_v26 = vadd.f32 1.0, %v2007_v14  ;;  %2020 = vtanh.f32 %v861_v6  ;;  %v862_v32 = vmul.f32 0.7978846, %v798_v7  ;;  %v864_v37 = vmul.f32 0.7978846, %v800_v12 }
 0x196   :  { %v2654_v39 = vpop.f32.mrb[13].mxu0  ;;  %v2656_v42 = vpop.eup %2010  ;;  %v1045_v21 = vmul.f32 0.5, %v981_v17  ;;  %2022 = vtanh.f32 %v863_v15  ;;  %v865_v2 = vmul.f32 0.7978846, %v801_v8  ;;  %v867_v47 = vmul.f32 0.7978846, %v803_v9 }
 0x197   :  { %v2658_v52 = vpop.f32.mrb[13].mxu1  ;;  %v2013_v53 = vpop.eup %2012  ;;  %v1047_v54 = vmul.f32 0.5, %v983_v26  ;;  %2024 = vtanh.f32 %v862_v32  ;;  %v674_v55 = vmul.f32 %v610_v13, %v2636_v59  ;;  %v612_v56 = vmul.f32 %v2640_v63, %v2640_v63 }
 0x198   :  { %v2663_v57 = vpop.f32.mrb[14].mxu0  ;;  %v2665_v35 = vpop.f32.mrb[14].mxu1  ;;  %v2668_v48 = vmul.f32 %v1045_v21, %v2527_v27  ;;  %v985_v49 = vadd.f32 1.0, %v2013_v53  ;;  %2026 = vtanh.f32 %v864_v37  ;;  %v2672_v3 = vadd.f32 %v2604_v0, %v2518_v19 }
 0x199   :  { %v2015_v5 = vpop.eup %2014  ;;  %v2674_v58 = vpop.f32.mrb[15].mxu0  ;;  %v2681_v62 = vmul.f32 %v1047_v54, %v2530_v30  ;;  %2028 = vtanh.f32 %v865_v2  ;;  %v738_v6 = vmul.f32 0.044715, %v674_v55  ;;  %v676_v12 = vmul.f32 %v612_v56, %v2640_v63 }
 0x19a   :  { %3549 = vst [vmem:[#allocation9_spill] sm:$0xff] %v2672_v3  ;;  %v2676_v60 = vpop.f32.mrb[15].mxu1  ;;  %v2678_v61 = vpop.eup %2016  ;;  %v987_v4 = vadd.f32 1.0, %v2015_v5  ;;  %v1049_v7 = vmul.f32 0.5, %v985_v49  ;;  %2030 = vtanh.f32 %v867_v47  ;;  %v613_v0 = vmul.f32 %v2672_v3, %v2672_v3 }
 0x19b   :  { %v2683_v27 = vpop.eup %2018  ;;  %v802_v14 = vadd.f32 %v738_v6, %v2636_v59  ;;  %v2691_v17 = vadd.f32 %v2606_v20, %v2520_v22  ;;  %v2695_v30 = vadd.f32 %v2613_v50, %v2522_v23  ;;  %v740_v8 = vmul.f32 0.044715, %v676_v12 }
 0x19c   :  { %v1051_v13 = vmul.f32 0.5, %v987_v4  ;;  %v2698_v15 = vmul.f32 %v1049_v7, %v2543_v11  ;;  %v677_v9 = vmul.f32 %v613_v0, %v2672_v3  ;;  %v2703_v26 = vadd.f32 %v2615_v51, %v2524_v24  ;;  %v2705_v32 = vpop.f32.mrb[16].mxu0  ;;  %v2707_v37 = vpop.f32.mrb[16].mxu1 }
 0x19d   :  { %3550 = vst [vmem:[#allocation10_spill] sm:$0xff] %v2691_v17  ;;  %3551 = vst [vmem:[#allocation11_spill] sm:$0xff] %v2695_v30  ;;  %v866_v21 = vmul.f32 0.7978846, %v802_v14  ;;  %v615_v50 = vmul.f32 %v2691_v17, %v2691_v17  ;;  %v614_v11 = vmul.f32 %v2695_v30, %v2695_v30  ;;  %v2716_v2 = vpop.f32.mrb[17].mxu0  ;;  %v2718_v47 = vpop.f32.mrb[17].mxu1  ;;  %v804_v53 = vadd.f32 %v740_v8, %v2640_v63 }
 0x19e   :  { %3552 = vst [vmem:[#allocation12_spill] sm:$0xff] %v2703_v26  ;;  %v2710_v20 = vmul.f32 %v1051_v13, %v2546_v40  ;;  %v741_v54 = vmul.f32 0.044715, %v677_v9  ;;  %v616_v40 = vmul.f32 %v2703_v26, %v2703_v26  ;;  %v2725_v55 = vpop.f32.mrb[18].mxu0  ;;  %v2727_v56 = vpop.f32.mrb[18].mxu1  ;;  %v2745_v9 = vadd.f32 %v2622_v28, %v2518_v19 }
 0x19f   :  { %v2729_v5 = vpop.eup %2020  ;;  %2032 = vtanh.f32 %v866_v21  ;;  %v679_v4 = vmul.f32 %v615_v50, %v2691_v17  ;;  %v678_v6 = vmul.f32 %v614_v11, %v2695_v30  ;;  %v2735_v7 = vpop.f32.mrb[19].mxu0  ;;  %v868_v13 = vmul.f32 0.7978846, %v804_v53 }
 0x1a0   :  { %v2737_v12 = vpop.f32.mrb[19].mxu1  ;;  %v2739_v0 = vpop.eup %2022  ;;  %v805_v14 = vadd.f32 %v741_v54, %v2672_v3  ;;  %v680_v8 = vmul.f32 %v616_v40, %v2703_v26  ;;  %3554 = vst [vmem:[#allocation14_spill] sm:$0xff] %v2745_v9  ;;  %v2751_v11 = vadd.f32 %v2624_v29, %v2520_v22  ;;  %v2755_v51 = vadd.f32 %v2628_v1, %v2522_v23 }
 0x1a1   :  { %3553 = vst [vmem:[#allocation13_spill] sm:$0xff] %v2739_v0  ;;  %v2747_v21 = vpop.eup %2024  ;;  %v743_v50 = vmul.f32 0.044715, %v679_v4  ;;  %v742_v49 = vmul.f32 0.044715, %v678_v6  ;;  %2034 = vtanh.f32 %v868_v13  ;;  %v617_v28 = vmul.f32 %v2745_v9, %v2745_v9 }
 0x1a2   :  { %3555 = vst [vmem:[#allocation15_spill] sm:$0xff] %v2751_v11  ;;  %3556 = vst [vmem:[#allocation16_spill] sm:$0xff] %v2755_v51  ;;  %v2757_v53 = vpop.eup %2026  ;;  %v869_v54 = vmul.f32 0.7978846, %v805_v14  ;;  %v744_v40 = vmul.f32 0.044715, %v680_v8  ;;  %v619_v29 = vmul.f32 %v2751_v11, %v2751_v11  ;;  %v618_v1 = vmul.f32 %v2755_v51, %v2755_v51 }
 0x1a3   :  { %v2761_v3 = vpop.eup %2028  ;;  %v807_v4 = vadd.f32 %v743_v50, %v2691_v17  ;;  %v806_v6 = vadd.f32 %v742_v49, %v2695_v30  ;;  %v681_v14 = vmul.f32 %v617_v28, %v2745_v9  ;;  %v2775_v8 = vadd.f32 %v2630_v34, %v2524_v24 }
 0x1a4   :  { %3557 = vst [vmem:[#allocation17_spill] sm:$0xff] %v2761_v3  ;;  %v2769_v44 = vpop.eup %2030  ;;  %2036 = vtanh.f32 %v869_v54  ;;  %v808_v13 = vadd.f32 %v744_v40, %v2703_v26  ;;  %v2777_v50 = vpop.f32.mrb[20].mxu0  ;;  %v683_v38 = vmul.f32 %v619_v29, %v2751_v11  ;;  %v682_v43 = vmul.f32 %v618_v1, %v2755_v51 }
 0x1a5   :  { %3558 = vst [vmem:[#allocation18_spill] sm:$0xff] %v2769_v44  ;;  %3559 = vst [vmem:[#allocation19_spill] sm:$0xff] %v2775_v8  ;;  %v2779_v49 = vpop.f32.mrb[20].mxu1  ;;  %v871_v17 = vmul.f32 0.7978846, %v807_v4  ;;  %v2783_v31 = vpop.f32.mrb[21].mxu0  ;;  %v620_v34 = vmul.f32 %v2775_v8, %v2775_v8  ;;  %v2791_v26 = vadd.f32 %v2648_v18, %v2518_v19  ;;  %v2799_v1 = vadd.f32 %v2650_v16, %v2520_v22 }
 0x1a6   :  { %v870_v30 = vmul.f32 0.7978846, %v806_v6  ;;  %v2785_v54 = vpop.f32.mrb[21].mxu1  ;;  %v872_v40 = vmul.f32 0.7978846, %v808_v13  ;;  %v2793_v44 = vpop.f32.mrb[22].mxu0 }
 0x1a7   :  { %v745_v28 = vmul.f32 0.044715, %v681_v14  ;;  %3560 = vst [vmem:[#allocation20_spill] sm:$0xff] %v2791_v26  ;;  %v2795_v4 = vpop.f32.mrb[22].mxu1  ;;  %2038 = vtanh.f32 %v871_v17  ;;  %v747_v6 = vmul.f32 0.044715, %v683_v38  ;;  %v684_v18 = vmul.f32 %v620_v34, %v2775_v8 }
 0x1a8   :  { %v746_v29 = vmul.f32 0.044715, %v682_v43  ;;  %3561 = vst [vmem:[#allocation21_spill] sm:$0xff] %v2799_v1  ;;  %v2801_v13 = vpop.f32.mrb[23].mxu0  ;;  %v2803_v14 = vpop.f32.mrb[23].mxu1  ;;  %2040 = vtanh.f32 %v870_v30  ;;  %v621_v63 = vmul.f32 %v2791_v26, %v2791_v26  ;;  %v623_v16 = vmul.f32 %v2799_v1, %v2799_v1 }
 0x1a9   :  { %v809_v0 = vadd.f32 %v745_v28, %v2745_v9  ;;  %v2809_v3 = vpop.eup %2032  ;;  %2042 = vtanh.f32 %v872_v40  ;;  %v811_v38 = vadd.f32 %v747_v6, %v2751_v11  ;;  %v748_v41 = vmul.f32 0.044715, %v684_v18 }
 0x1aa   :  { %v810_v43 = vadd.f32 %v746_v29, %v2755_v51  ;;  %v685_v30 = vmul.f32 %v621_v63, %v2791_v26  ;;  %v2818_v28 = vadd.f32 %v2654_v39, %v2522_v23  ;;  %v687_v59 = vmul.f32 %v623_v16, %v2799_v1 }
 0x1ab   :  { %v873_v17 = vmul.f32 0.7978846, %v809_v0  ;;  %v875_v34 = vmul.f32 0.7978846, %v811_v38  ;;  %v2823_v40 = vadd.f32 %v2658_v52, %v2524_v24  ;;  %v2825_v6 = vpop.eup %2034  ;;  %v812_v0 = vadd.f32 %v748_v41, %v2775_v8 }
 0x1ac   :  { %3562 = vst [vmem:[#allocation22_spill] sm:$0xff] %v2818_v28  ;;  %v874_v9 = vmul.f32 0.7978846, %v810_v43  ;;  %v749_v29 = vmul.f32 0.044715, %v685_v30  ;;  %v622_v63 = vmul.f32 %v2818_v28, %v2818_v28  ;;  %v2830_v18 = vpop.f32.mrb[24].mxu0  ;;  %v2838_v52 = vadd.f32 %v2663_v57, %v2518_v19 }
 0x1ad   :  { %3563 = vst [vmem:[#allocation23_spill] sm:$0xff] %v2823_v40  ;;  %2044 = vtanh.f32 %v873_v17  ;;  %v2832_v39 = vpop.f32.mrb[24].mxu1  ;;  %v751_v38 = vmul.f32 0.044715, %v687_v59  ;;  %v624_v43 = vmul.f32 %v2823_v40, %v2823_v40  ;;  %v2840_v16 = vpop.f32.mrb[25].mxu0 }
 0x1ae   :  { %2046 = vtanh.f32 %v875_v34  ;;  %3564 = vst [vmem:[#allocation24_spill] sm:$0xff] %v2838_v52  ;;  %3565 = vst [vmem:[#allocation25_spill] sm:$0xff] %v2840_v16  ;;  %v2842_v41 = vpop.f32.mrb[25].mxu1  ;;  %v2844_v17 = vpop.eup %2036  ;;  %v876_v30 = vmul.f32 0.7978846, %v812_v0  ;;  %v813_v11 = vadd.f32 %v749_v29, %v2791_v26  ;;  %v686_v34 = vmul.f32 %v622_v63, %v2818_v28 }
 0x1af   :  { %3566 = vst [vmem:[#allocation26_spill] sm:$0xff] %v2844_v17  ;;  %2048 = vtanh.f32 %v874_v9  ;;  %v2848_v59 = vpop.f32.mrb[26].mxu0  ;;  %v2850_v8 = vpop.f32.mrb[26].mxu1  ;;  %v815_v51 = vadd.f32 %v751_v38, %v2799_v1  ;;  %v688_v57 = vmul.f32 %v624_v43, %v2823_v40  ;;  %v625_v16 = vmul.f32 %v2838_v52, %v2838_v52 }
 0x1b0   :  { %3567 = vst [vmem:[#allocation27_spill] sm:$0xff] %v2848_v59  ;;  %3568 = vst [vmem:[#allocation28_spill] sm:$0xff] %v2850_v8  ;;  %v2858_v17 = vadd.f32 %v2665_v35, %v2520_v22  ;;  %v2860_v9 = vpop.f32.mrb[27].mxu0  ;;  %v2862_v0 = vpop.f32.mrb[27].mxu1  ;;  %2050 = vtanh.f32 %v876_v30  ;;  %v877_v29 = vmul.f32 0.7978846, %v813_v11  ;;  %v2866_v26 = vadd.f32 %v2674_v58, %v2522_v23 }
 0x1b1   :  { %v750_v63 = vmul.f32 0.044715, %v686_v34  ;;  %v2868_v38 = vpop.eup %2038  ;;  %v879_v43 = vmul.f32 0.7978846, %v815_v51  ;;  %v752_v1 = vmul.f32 0.044715, %v688_v57  ;;  %v689_v8 = vmul.f32 %v625_v16, %v2838_v52 }
 0x1b2   :  { %3569 = vst [vmem:[#allocation29_spill] sm:$0xff] %v2858_v17  ;;  %3570 = vst [vmem:[#allocation30_spill] sm:$0xff] %v2866_v26  ;;  %v627_v35 = vmul.f32 %v2858_v17, %v2858_v17  ;;  %v2873_v59 = vpop.eup %2040  ;;  %2052 = vtanh.f32 %v877_v29  ;;  %v626_v11 = vmul.f32 %v2866_v26, %v2866_v26  ;;  %v2880_v58 = vadd.f32 %v2676_v60, %v2524_v24 }
 0x1b3   :  { %3571 = vst [vmem:[#allocation31_spill] sm:$0xff] %v2868_v38  ;;  %3572 = vst [vmem:[#allocation32_spill] sm:$0xff] %v2873_v59  ;;  %v814_v30 = vadd.f32 %v750_v63, %v2818_v28  ;;  %v2882_v34 = vpop.eup %2042  ;;  %2054 = vtanh.f32 %v879_v43  ;;  %v816_v51 = vadd.f32 %v752_v1, %v2823_v40  ;;  %v753_v16 = vmul.f32 0.044715, %v689_v8 }
 0x1b4   :  { %3573 = vst [vmem:[#allocation33_spill] sm:$0xff] %v2880_v58  ;;  %v691_v57 = vmul.f32 %v627_v35, %v2858_v17  ;;  %v690_v29 = vmul.f32 %v626_v11, %v2866_v26  ;;  %v628_v63 = vmul.f32 %v2880_v58, %v2880_v58  ;;  %v2891_v28 = vadd.f32 %v2705_v32, %v2518_v19  ;;  %v2893_v60 = vpop.f32.mrb[28].mxu0  ;;  %v2895_v59 = vpop.f32.mrb[28].mxu1 }
 0x1b5   :  { %v878_v38 = vmul.f32 0.7978846, %v814_v30  ;;  %3575 = vst [vmem:[#allocation35_spill] sm:$0xff] %v2893_v60  ;;  %3576 = vst [vmem:[#allocation36_spill] sm:$0xff] %v2895_v59  ;;  %v880_v43 = vmul.f32 0.7978846, %v816_v51  ;;  %v817_v1 = vadd.f32 %v753_v16, %v2838_v52  ;;  %v2900_v35 = vadd.f32 %v2707_v37, %v2520_v22 }
 0x1b6   :  { %3574 = vst [vmem:[#allocation34_spill] sm:$0xff] %v2891_v28  ;;  %v755_v8 = vmul.f32 0.044715, %v691_v57  ;;  %v2902_v30 = vpop.f32.mrb[29].mxu0  ;;  %v2904_v11 = vpop.f32.mrb[29].mxu1  ;;  %v692_v60 = vmul.f32 %v628_v63, %v2880_v58  ;;  %v629_v51 = vmul.f32 %v2891_v28, %v2891_v28 }
 0x1b7   :  { %3577 = vst [vmem:[#allocation37_spill] sm:$0xff] %v2900_v35  ;;  %3578 = vst [vmem:[#allocation38_spill] sm:$0xff] %v2902_v30  ;;  %v2906_v40 = vpop.eup %2044  ;;  %2056 = vtanh.f32 %v878_v38  ;;  %v754_v32 = vmul.f32 0.044715, %v690_v29  ;;  %v2911_v59 = vpop.f32.mrb[30].mxu0 }
 0x1b8   :  { %3579 = vst [vmem:[#allocation39_spill] sm:$0xff] %v2904_v11  ;;  %3580 = vst [vmem:[#allocation40_spill] sm:$0xff] %v2911_v59  ;;  %v2913_v16 = vpop.f32.mrb[30].mxu1  ;;  %v2915_v57 = vpop.eup %2046  ;;  %2058 = vtanh.f32 %v880_v43  ;;  %v881_v37 = vmul.f32 0.7978846, %v817_v1  ;;  %v819_v52 = vadd.f32 %v755_v8, %v2858_v17  ;;  %v631_v11 = vmul.f32 %v2900_v35, %v2900_v35 }
 0x1b9   :  { %3581 = vst [vmem:[#allocation41_spill] sm:$0xff] %v2913_v16  ;;  %v2920_v38 = vpop.f32.mrb[31].mxu0  ;;  %v2922_v29 = vpop.f32.mrb[31].mxu1  ;;  %v818_v30 = vadd.f32 %v754_v32, %v2866_v26  ;;  %v756_v59 = vmul.f32 0.044715, %v692_v60  ;;  %v693_v16 = vmul.f32 %v629_v51, %v2891_v28  ;;  %v2930_v43 = vadd.f32 %v2716_v2, %v2522_v23 }
 0x1ba   :  { %3582 = vst [vmem:[#allocation42_spill] sm:$0xff] %v2920_v38  ;;  %3583 = vst [vmem:[#allocation43_spill] sm:$0xff] %v2922_v29  ;;  %v2924_v63 = vpop.eup %2048  ;;  %2060 = vtanh.f32 %v881_v37  ;;  %v883_v1 = vmul.f32 0.7978846, %v819_v52  ;;  %v695_v8 = vmul.f32 %v631_v11, %v2900_v35  ;;  %v2935_v17 = vadd.f32 %v2718_v47, %v2524_v24 }
 0x1bb   :  { %3584 = vst [vmem:[#allocation44_spill] sm:$0xff] %v2930_v43  ;;  %v2937_v29 = vpop.eup %2050  ;;  %v882_v38 = vmul.f32 0.7978846, %v818_v30  ;;  %v820_v32 = vadd.f32 %v756_v59, %v2880_v58  ;;  %v757_v60 = vmul.f32 0.044715, %v693_v16  ;;  %v630_v51 = vmul.f32 %v2930_v43, %v2930_v43 }
 0x1bc   :  { %3585 = vst [vmem:[#allocation45_spill] sm:$0xff] %v2935_v17  ;;  %2062 = vtanh.f32 %v883_v1  ;;  %v759_v2 = vmul.f32 0.044715, %v695_v8  ;;  %v632_v52 = vmul.f32 %v2935_v17, %v2935_v17  ;;  %v2946_v11 = vadd.f32 %v2725_v55, %v2518_v19  ;;  %v2948_v47 = vpop.eup %2052 }
 0x1bd   :  { %3586 = vst [vmem:[#allocation46_spill] sm:$0xff] %v2948_v47  ;;  %2064 = vtanh.f32 %v882_v38  ;;  %v884_v37 = vmul.f32 0.7978846, %v820_v32  ;;  %v821_v30 = vadd.f32 %v757_v60, %v2891_v28  ;;  %v694_v59 = vmul.f32 %v630_v51, %v2930_v43  ;;  %v2952_v16 = vpop.eup %2054 }
 0x1be   :  { %3587 = vst [vmem:[#allocation47_spill] sm:$0xff] %v2952_v16  ;;  %v823_v1 = vadd.f32 %v759_v2, %v2900_v35  ;;  %v696_v8 = vmul.f32 %v632_v52, %v2935_v17  ;;  %v633_v58 = vmul.f32 %v2946_v11, %v2946_v11  ;;  %v2960_v55 = vadd.f32 %v2727_v56, %v2520_v22 }
 0x1bf   :  { %2066 = vtanh.f32 %v884_v37  ;;  %v885_v38 = vmul.f32 0.7978846, %v821_v30  ;;  %v758_v32 = vmul.f32 0.044715, %v694_v59  ;;  %v2964_v60 = vadd.f32 %v2735_v7, %v2522_v23 }
 0x1c0   :  { %v887_v51 = vmul.f32 0.7978846, %v823_v1  ;;  %v760_v28 = vmul.f32 0.044715, %v696_v8  ;;  %v697_v2 = vmul.f32 %v633_v58, %v2946_v11  ;;  %v635_v52 = vmul.f32 %v2960_v55, %v2960_v55 }
 0x1c1   :  { %v2969_v35 = vpop.eup %2056  ;;  %2068 = vtanh.f32 %v885_v38  ;;  %v822_v56 = vadd.f32 %v758_v32, %v2930_v43  ;;  %v634_v37 = vmul.f32 %v2964_v60, %v2964_v60  ;;  %v2976_v30 = vadd.f32 %v2737_v12, %v2524_v24 }
 0x1c2   :  { %v2978_v7 = vpop.eup %2058  ;;  %2070 = vtanh.f32 %v887_v51  ;;  %v824_v58 = vadd.f32 %v760_v28, %v2935_v17  ;;  %v761_v59 = vmul.f32 0.044715, %v697_v2  ;;  %v699_v1 = vmul.f32 %v635_v52, %v2960_v55 }
 0x1c3   :  { %3588 = vst [vmem:[#allocation48_spill] sm:$0xff] %v2978_v7  ;;  %v886_v8 = vmul.f32 0.7978846, %v822_v56  ;;  %v698_v38 = vmul.f32 %v634_v37, %v2964_v60  ;;  %v636_v32 = vmul.f32 %v2976_v30, %v2976_v30  ;;  %v982_v43 = vadd.f32 1.0, %v2652_v25 }
 0x1c4   :  { %v2986_v16 = vpop.eup %2060  ;;  %v888_v12 = vmul.f32 0.7978846, %v824_v58  ;;  %v825_v26 = vadd.f32 %v761_v59, %v2946_v11  ;;  %v763_v47 = vmul.f32 0.044715, %v699_v1  ;;  %v986_v51 = vadd.f32 1.0, %v2678_v61 }
 0x1c5   :  { %2072 = vtanh.f32 %v886_v8  ;;  %v762_v28 = vmul.f32 0.044715, %v698_v38  ;;  %v700_v2 = vmul.f32 %v636_v32, %v2976_v30  ;;  %v1046_v52 = vmul.f32 0.5, %v982_v43 }
 0x1c6   :  { %v2991_v56 = vpop.eup %2062  ;;  %2074 = vtanh.f32 %v888_v12  ;;  %v889_v37 = vmul.f32 0.7978846, %v825_v26  ;;  %v827_v17 = vadd.f32 %v763_v47, %v2960_v55  ;;  %v1050_v25 = vmul.f32 0.5, %v986_v51 }
 0x1c7   :  { %v2994_v7 = vpop.eup %2064  ;;  %v826_v58 = vadd.f32 %v762_v28, %v2964_v60  ;;  %v764_v59 = vmul.f32 0.044715, %v700_v2  ;;  %v1110_v1 = vmul.f32 %v1046_v52, %v2533_v33  ;;  %v984_v61 = vadd.f32 1.0, %v2656_v42 }
 0x1c8   :  { %2076 = vtanh.f32 %v889_v37  ;;  %v891_v8 = vmul.f32 0.7978846, %v827_v17  ;;  %v1114_v43 = vmul.f32 %v1050_v25, %v2553_v45  ;;  %v988_v38 = vadd.f32 1.0, %v2683_v27 }
 0x1c9   :  { %v3001_v32 = vpop.eup %2066  ;;  %v890_v26 = vmul.f32 0.7978846, %v826_v58  ;;  %v828_v47 = vadd.f32 %v764_v59, %v2976_v30  ;;  %v1048_v12 = vmul.f32 0.5, %v984_v61  ;;  %v3006_v51 = vadd.f32 %v2777_v50, %v2518_v19 }
 0x1ca   :  { %2078 = vtanh.f32 %v891_v8  ;;  %v1174_v33 = vpack.c.bf16 %v1114_v43, %v1110_v1  ;;  %v1052_v28 = vmul.f32 0.5, %v988_v38  ;;  %v3010_v42 = vadd.f32 %v2779_v49, %v2520_v22 }
 0x1cb   :  { %3589 = vst [vmem:[#allocation49_spill] sm:$0xff] %v3006_v51  ;;  %v3012_v45 = vpop.eup %2068  ;;  %2080 = vtanh.f32 %v890_v26  ;;  %v892_v27 = vmul.f32 0.7978846, %v828_v47  ;;  %v1112_v17 = vmul.f32 %v1048_v12, %v2536_v36  ;;  %v637_v2 = vmul.f32 %v3006_v51, %v3006_v51 }
 0x1cc   :  { %3590 = vst [vmem:[#allocation50_spill] sm:$0xff] %v3010_v42  ;;  %v3017_v52 = vpop.eup %2070  ;;  %1500 = vmatprep.mubr.bf16.mxu0 %v1174_v33  ;;  %v1116_v50 = vmul.f32 %v1052_v28, %v2556_v46  ;;  %v639_v37 = vmul.f32 %v3010_v42, %v3010_v42  ;;  %v3024_v49 = vadd.f32 %v2783_v31, %v2522_v23 }
 0x1cd   :  { %v3028_v25 = vadd.f32 %v2785_v54, %v2524_v24  ;;  %2082 = vtanh.f32 %v892_v27  ;;  %v3591_v36 = vpack.c.bf16 %v2698_v15, %v2668_v48  ;;  %v701_v58 = vmul.f32 %v637_v2, %v3006_v51 }
 0x1ce   :  { %v3036_v46 = vadd.f32 %v2793_v44, %v2518_v19  ;;  %v3040_v59 = vadd.f32 %v2795_v4, %v2520_v22  ;;  %v1176_v31 = vpack.c.bf16 %v1116_v50, %v1112_v17  ;;  %v703_v1 = vmul.f32 %v639_v37, %v3010_v42 }
 0x1cf   :  { %1501 = vmatmul.mubr.bf16.vlgmr.msra.gmra.mrb[32].mxu0 %v3591_v36  ;;  %v638_v54 = vmul.f32 %v3024_v49, %v3024_v49  ;;  %v640_v48 = vmul.f32 %v3028_v25, %v3028_v25  ;;  %v3047_v15 = vpop.eup %2072  ;;  %v765_v61 = vmul.f32 0.044715, %v701_v58  ;;  %v3055_v4 = vadd.f32 %v2801_v13, %v2522_v23 }
 0x1d0   :  { %3592 = vst [vmem:[#allocation51_spill] sm:$0xff] %v3036_v46  ;;  %3593 = vst [vmem:[#allocation52_spill] sm:$0xff] %v3040_v59  ;;  %v641_v44 = vmul.f32 %v3036_v46, %v3036_v46  ;;  %v643_v8 = vmul.f32 %v3040_v59, %v3040_v59  ;;  %v3057_v43 = vpop.eup %2074  ;;  %1597 = vmatprep.mubr.bf16.mxu1 %v1176_v31  ;;  %v767_v38 = vmul.f32 0.044715, %v703_v1 }
 0x1d1   :  { %v702_v26 = vmul.f32 %v638_v54, %v3024_v49  ;;  %v704_v47 = vmul.f32 %v640_v48, %v3028_v25  ;;  %v3063_v12 = vadd.f32 %v2803_v14, %v2524_v24  ;;  %v3594_v33 = vpack.c.bf16 %v2710_v20, %v2681_v62 }
 0x1d2   :  { %v829_v28 = vadd.f32 %v765_v61, %v3006_v51  ;;  %v705_v13 = vmul.f32 %v641_v44, %v3036_v46  ;;  %v707_v27 = vmul.f32 %v643_v8, %v3040_v59  ;;  %v642_v17 = vmul.f32 %v3055_v4, %v3055_v4  ;;  %v3073_v2 = vpop.eup %2076 }
 0x1d3   :  { %1598 = vmatmul.mubr.bf16.vlgmr.msra.gmra.mrb[32].mxu1 %v3594_v33  ;;  %v831_v50 = vadd.f32 %v767_v38, %v3010_v42  ;;  %v766_v37 = vmul.f32 0.044715, %v702_v26  ;;  %v768_v14 = vmul.f32 0.044715, %v704_v47  ;;  %v644_v36 = vmul.f32 %v3063_v12, %v3063_v12 }
 0x1d4   :  { %v893_v62 = vmul.f32 0.7978846, %v829_v28  ;;  %v769_v20 = vmul.f32 0.044715, %v705_v13  ;;  %v771_v58 = vmul.f32 0.044715, %v707_v27  ;;  %v706_v31 = vmul.f32 %v642_v17, %v3055_v4  ;;  %v3079_v1 = vpop.eup %2078 }
 0x1d5   :  { %v895_v54 = vmul.f32 0.7978846, %v831_v50  ;;  %v830_v48 = vadd.f32 %v766_v37, %v3024_v49  ;;  %v832_v61 = vadd.f32 %v768_v14, %v3028_v25  ;;  %v708_v44 = vmul.f32 %v644_v36, %v3063_v12  ;;  %v3084_v8 = vpop.eup %2080 }
 0x1d6   :  { %2084 = vtanh.f32 %v893_v62  ;;  %v833_v38 = vadd.f32 %v769_v20, %v3036_v46  ;;  %v835_v26 = vadd.f32 %v771_v58, %v3040_v59  ;;  %v770_v47 = vmul.f32 0.044715, %v706_v31 }
 0x1d7   :  { %2086 = vtanh.f32 %v895_v54  ;;  %v894_v33 = vmul.f32 0.7978846, %v830_v48  ;;  %v896_v28 = vmul.f32 0.7978846, %v832_v61  ;;  %v772_v13 = vmul.f32 0.044715, %v708_v44  ;;  %v3088_v27 = vpop.eup %2082 }
 0x1d8   :  { %v897_v17 = vmul.f32 0.7978846, %v833_v38  ;;  %v899_v50 = vmul.f32 0.7978846, %v835_v26  ;;  %v834_v37 = vadd.f32 %v770_v47, %v3055_v4  ;;  %v990_v14 = vadd.f32 1.0, %v2747_v21  ;;  %v3595_v47 = vld [vmem:[#allocation7_spill] sm:$0xff] }
 0x1d9   :  { %2088 = vtanh.f32 %v894_v33  ;;  %v836_v36 = vadd.f32 %v772_v13, %v3063_v12  ;;  %v994_v62 = vadd.f32 1.0, %v2809_v3  ;;  %v992_v20 = vadd.f32 1.0, %v2757_v53  ;;  %v3596_v33 = vld [vmem:[#allocation4_spill] sm:$0xff] }
 0x1da   :  { %2090 = vtanh.f32 %v896_v28  ;;  %v898_v58 = vmul.f32 0.7978846, %v834_v37  ;;  %v1054_v31 = vmul.f32 0.5, %v990_v14  ;;  %v996_v54 = vadd.f32 1.0, %v2825_v6  ;;  %v3597_v28 = vld [vmem:[#allocation17_spill] sm:$0xff]  ;;  %v3598_v37 = vld [vmem:[#allocation8_spill] sm:$0xff] }
 0x1db   :  { %2092 = vtanh.f32 %v897_v17  ;;  %v900_v48 = vmul.f32 0.7978846, %v836_v36  ;;  %v1058_v61 = vmul.f32 0.5, %v994_v62  ;;  %v1056_v44 = vmul.f32 0.5, %v992_v20  ;;  %v3599_v14 = vld [vmem:[#allocation13_spill] sm:$0xff]  ;;  %v3600_v20 = vld [vmem:[#allocation18_spill] sm:$0xff] }
 0x1dc   :  { %2094 = vtanh.f32 %v899_v50  ;;  %v1118_v38 = vmul.f32 %v1054_v31, %v2591_v10  ;;  %v1060_v21 = vmul.f32 0.5, %v996_v54  ;;  %v989_v26 = vadd.f32 1.0, %v2729_v5  ;;  %v3602_v54 = vld [vmem:[#allocation2_spill] sm:$0xff] }
 0x1dd   :  { %2096 = vtanh.f32 %v898_v58  ;;  %v1122_v3 = vmul.f32 %v1058_v61, %v3595_v47  ;;  %v1120_v53 = vmul.f32 %v1056_v44, %v3596_v33  ;;  %v993_v13 = vadd.f32 1.0, %v3597_v28 }
 0x1de   :  { %2098 = vtanh.f32 %v900_v48  ;;  %v1124_v6 = vmul.f32 %v1060_v21, %v3598_v37  ;;  %v1053_v17 = vmul.f32 0.5, %v989_v26  ;;  %v991_v36 = vadd.f32 1.0, %v3599_v14  ;;  %v3608_v37 = vld [vmem:[#allocation27_spill] sm:$0xff] }
 0x1df   :  { %v1178_v62 = vpack.c.bf16 %v1122_v3, %v1118_v38  ;;  %v1057_v50 = vmul.f32 0.5, %v993_v13  ;;  %v995_v10 = vadd.f32 1.0, %v3600_v20  ;;  %v3106_v5 = vadd.f32 %v2830_v18, %v2518_v19  ;;  %v3604_v38 = vld [vmem:[#allocation5_spill] sm:$0xff] }
 0x1e0   :  { %v3108_v58 = vpop.eup %2084  ;;  %v1180_v31 = vpack.c.bf16 %v1124_v6, %v1120_v53  ;;  %v1117_v61 = vmul.f32 %v1053_v17, %v3602_v54  ;;  %v1055_v44 = vmul.f32 0.5, %v991_v36  ;;  %v3113_v48 = vadd.f32 %v2832_v39, %v2520_v22  ;;  %v3605_v3 = vld [vmem:[#allocation25_spill] sm:$0xff]  ;;  %v3607_v53 = vld [vmem:[#allocation3_spill] sm:$0xff]  ;;  %v3610_v36 = vld [vmem:[#allocation6_spill] sm:$0xff] }
 0x1e1   :  { %3601 = vst [vmem:[#allocation7_spill] sm:$0xff] %v3106_v5  ;;  %v3115_v21 = vpop.eup %2086  ;;  %1508 = vmatprep.mubr.bf16.mxu0 %v1178_v62  ;;  %v1121_v26 = vmul.f32 %v1057_v50, %v3604_v38  ;;  %v1059_v47 = vmul.f32 0.5, %v995_v10  ;;  %v645_v18 = vmul.f32 %v3106_v5, %v3106_v5  ;;  %v3122_v33 = vadd.f32 %v3605_v3, %v2522_v23 }
 0x1e2   :  { %3603 = vst [vmem:[#allocation4_spill] sm:$0xff] %v3113_v48  ;;  %1605 = vmatprep.mubr.bf16.mxu1 %v1180_v31  ;;  %v1119_v28 = vmul.f32 %v1055_v44, %v3607_v53  ;;  %v647_v39 = vmul.f32 %v3113_v48, %v3113_v48  ;;  %v3129_v13 = vadd.f32 %v2842_v41, %v2524_v24  ;;  %v3611_v44 = vld [vmem:[#allocation28_spill] sm:$0xff] }
 0x1e3   :  { %3606 = vst [vmem:[#allocation17_spill] sm:$0xff] %v3122_v33  ;;  %v3133_v6 = vadd.f32 %v3608_v37, %v2518_v19  ;;  %v3135_v17 = vpop.eup %2088  ;;  %v1177_v14 = vpack.c.bf16 %v1121_v26, %v1117_v61  ;;  %v1123_v62 = vmul.f32 %v1059_v47, %v3610_v36  ;;  %v709_v50 = vmul.f32 %v645_v18, %v3106_v5 }
 0x1e4   :  { %v646_v20 = vmul.f32 %v3122_v33, %v3122_v33  ;;  %v3141_v10 = vpop.eup %2090  ;;  %v711_v31 = vmul.f32 %v647_v39, %v3113_v48  ;;  %v648_v41 = vmul.f32 %v3129_v13, %v3129_v13  ;;  %v3150_v61 = vadd.f32 %v3611_v44, %v2520_v22 }
 0x1e5   :  { %3609 = vst [vmem:[#allocation8_spill] sm:$0xff] %v3133_v6  ;;  %v649_v54 = vmul.f32 %v3133_v6, %v3133_v6  ;;  %v3152_v38 = vpop.eup %2092  ;;  %1509 = vmatmul.mubr.bf16.gmra.mrb[36].mxu0 %v1177_v14  ;;  %v1179_v26 = vpack.c.bf16 %v1123_v62, %v1119_v28  ;;  %v773_v47 = vmul.f32 0.044715, %v709_v50  ;;  %v3157_v3 = vadd.f32 %v2860_v9, %v2522_v23 }
 0x1e6   :  { %3612 = vst [vmem:[#allocation13_spill] sm:$0xff] %v3150_v61  ;;  %v710_v18 = vmul.f32 %v646_v20, %v3122_v33  ;;  %v3159_v53 = vpop.eup %2094  ;;  %v775_v39 = vmul.f32 0.044715, %v711_v31  ;;  %v712_v37 = vmul.f32 %v648_v41, %v3129_v13  ;;  %v651_v44 = vmul.f32 %v3150_v61, %v3150_v61 }
 0x1e7   :  { %v713_v36 = vmul.f32 %v649_v54, %v3133_v6  ;;  %v3165_v59 = vpop.eup %2096  ;;  %1606 = vmatmul.mubr.bf16.gmra.mrb[36].mxu1 %v1179_v26  ;;  %v837_v28 = vadd.f32 %v773_v47, %v3106_v5  ;;  %v650_v9 = vmul.f32 %v3157_v3, %v3157_v3  ;;  %v3172_v62 = vadd.f32 %v2862_v0, %v2524_v24 }
 0x1e8   :  { %v774_v14 = vmul.f32 0.044715, %v710_v18  ;;  %v3174_v50 = vpop.eup %2098  ;;  %v839_v20 = vadd.f32 %v775_v39, %v3113_v48  ;;  %v776_v31 = vmul.f32 0.044715, %v712_v37  ;;  %v715_v54 = vmul.f32 %v651_v44, %v3150_v61 }
 0x1e9   :  { %3613 = vst [vmem:[#allocation18_spill] sm:$0xff] %v3172_v62  ;;  %v777_v41 = vmul.f32 0.044715, %v713_v36  ;;  %v901_v42 = vmul.f32 0.7978846, %v837_v28  ;;  %v714_v47 = vmul.f32 %v650_v9, %v3157_v3  ;;  %v652_v18 = vmul.f32 %v3172_v62, %v3172_v62 }
 0x1ea   :  { %v838_v26 = vadd.f32 %v774_v14, %v3122_v33  ;;  %v903_v5 = vmul.f32 0.7978846, %v839_v20  ;;  %v840_v0 = vadd.f32 %v776_v31, %v3129_v13  ;;  %v779_v51 = vmul.f32 0.044715, %v715_v54  ;;  %v3614_v20 = vld [vmem:[#allocation32_spill] sm:$0xff] }
 0x1eb   :  { %v841_v46 = vadd.f32 %v777_v41, %v3133_v6  ;;  %2100 = vtanh.f32 %v901_v42  ;;  %v778_v37 = vmul.f32 0.044715, %v714_v47  ;;  %v716_v36 = vmul.f32 %v652_v18, %v3172_v62 }
 0x1ec   :  { %v902_v39 = vmul.f32 0.7978846, %v838_v26  ;;  %2102 = vtanh.f32 %v903_v5  ;;  %v904_v44 = vmul.f32 0.7978846, %v840_v0  ;;  %v843_v14 = vadd.f32 %v779_v51, %v3150_v61  ;;  %v3615_v0 = vld [vmem:[#allocation11_spill] sm:$0xff] }
 0x1ed   :  { %v905_v28 = vmul.f32 0.7978846, %v841_v46  ;;  %v842_v9 = vadd.f32 %v778_v37, %v3157_v3  ;;  %v780_v48 = vmul.f32 0.044715, %v716_v36  ;;  %v998_v33 = vadd.f32 1.0, %v3614_v20  ;;  %v3616_v37 = vld [vmem:[#allocation26_spill] sm:$0xff] }
 0x1ee   :  { %2104 = vtanh.f32 %v902_v39  ;;  %v907_v31 = vmul.f32 0.7978846, %v843_v14  ;;  %v1002_v41 = vadd.f32 1.0, %v2924_v63  ;;  %v1000_v42 = vadd.f32 1.0, %v2882_v34  ;;  %v3618_v34 = vld [vmem:[#allocation12_spill] sm:$0xff] }
 0x1ef   :  { %2106 = vtanh.f32 %v904_v44  ;;  %v906_v54 = vmul.f32 0.7978846, %v842_v9  ;;  %v844_v5 = vadd.f32 %v780_v48, %v3172_v62  ;;  %v1062_v26 = vmul.f32 0.5, %v998_v33  ;;  %v3617_v44 = vld [vmem:[#allocation16_spill] sm:$0xff]  ;;  %v3619_v33 = vld [vmem:[#allocation31_spill] sm:$0xff] }
 0x1f0   :  { %2108 = vtanh.f32 %v905_v28  ;;  %v1066_v46 = vmul.f32 0.5, %v1002_v41  ;;  %v1004_v51 = vadd.f32 1.0, %v2937_v29  ;;  %v1064_v47 = vmul.f32 0.5, %v1000_v42  ;;  %v3620_v41 = vld [vmem:[#allocation19_spill] sm:$0xff] }
 0x1f1   :  { %2110 = vtanh.f32 %v907_v31  ;;  %v908_v18 = vmul.f32 0.7978846, %v844_v5  ;;  %v1126_v39 = vmul.f32 %v1062_v26, %v3615_v0  ;;  %v997_v36 = vadd.f32 1.0, %v3616_v37  ;;  %v3621_v5 = vld [vmem:[#allocation35_spill] sm:$0xff] }
 0x1f2   :  { %2112 = vtanh.f32 %v906_v54  ;;  %v1130_v63 = vmul.f32 %v1066_v46, %v3617_v44  ;;  %v1068_v14 = vmul.f32 0.5, %v1004_v51  ;;  %v1128_v28 = vmul.f32 %v1064_v47, %v3618_v34  ;;  %v3623_v51 = vld [vmem:[#allocation9_spill] sm:$0xff] }
 0x1f3   :  { %v1001_v9 = vadd.f32 1.0, %v2906_v40  ;;  %2114 = vtanh.f32 %v908_v18  ;;  %v1061_v48 = vmul.f32 0.5, %v997_v36  ;;  %v999_v20 = vadd.f32 1.0, %v3619_v33  ;;  %v3624_v18 = vld [vmem:[#allocation36_spill] sm:$0xff] }
 0x1f4   :  { %v1003_v29 = vadd.f32 1.0, %v2915_v57  ;;  %v1182_v31 = vpack.c.bf16 %v1130_v63, %v1126_v39  ;;  %v1132_v42 = vmul.f32 %v1068_v14, %v3620_v41  ;;  %v3202_v26 = vadd.f32 %v3621_v5, %v2518_v19  ;;  %v3627_v39 = vld [vmem:[#allocation14_spill] sm:$0xff] }
 0x1f5   :  { %v1065_v54 = vmul.f32 0.5, %v1001_v9  ;;  %v3204_v46 = vpop.eup %2100  ;;  %v1125_v47 = vmul.f32 %v1061_v48, %v3623_v51  ;;  %v1063_v0 = vmul.f32 0.5, %v999_v20  ;;  %v3209_v37 = vadd.f32 %v3624_v18, %v2520_v22  ;;  %v3628_v14 = vld [vmem:[#allocation38_spill] sm:$0xff]  ;;  %v3630_v20 = vld [vmem:[#allocation15_spill] sm:$0xff] }
 0x1f6   :  { %3622 = vst [vmem:[#allocation2_spill] sm:$0xff] %v3202_v26  ;;  %v1067_v40 = vmul.f32 0.5, %v1003_v29  ;;  %v3211_v36 = vpop.eup %2102  ;;  %1516 = vmatprep.mubr.bf16.mxu0 %v1182_v31  ;;  %v1184_v57 = vpack.c.bf16 %v1132_v42, %v1128_v28  ;;  %v653_v63 = vmul.f32 %v3202_v26, %v3202_v26  ;;  %v3218_v34 = vadd.f32 %v3628_v14, %v2522_v23  ;;  %v3629_v48 = vld [vmem:[#allocation10_spill] sm:$0xff]  ;;  %v3631_v28 = vld [vmem:[#allocation39_spill] sm:$0xff] }
 0x1f7   :  { %3625 = vst [vmem:[#allocation5_spill] sm:$0xff] %v3209_v37  ;;  %3626 = vst [vmem:[#allocation25_spill] sm:$0xff] %v3211_v36  ;;  %v1129_v44 = vmul.f32 %v1065_v54, %v3627_v39  ;;  %v1127_v33 = vmul.f32 %v1063_v0, %v3629_v48  ;;  %v655_v41 = vmul.f32 %v3209_v37, %v3209_v37  ;;  %v3632_v0 = vld [vmem:[#allocation40_spill] sm:$0xff] }
 0x1f8   :  { %v3220_v9 = vpop.eup %2104  ;;  %v1131_v29 = vmul.f32 %v1067_v40, %v3630_v20  ;;  %v3228_v31 = vadd.f32 %v3631_v28, %v2524_v24  ;;  %1613 = vmatprep.mubr.bf16.mxu1 %v1184_v57  ;;  %v717_v5 = vmul.f32 %v653_v63, %v3202_v26  ;;  %v654_v51 = vmul.f32 %v3218_v34, %v3218_v34  ;;  %v3633_v57 = vld [vmem:[#allocation41_spill] sm:$0xff] }
 0x1f9   :  { %v3230_v42 = vpop.eup %2106  ;;  %v1181_v54 = vpack.c.bf16 %v1129_v44, %v1125_v47  ;;  %v3237_v18 = vadd.f32 %v3632_v0, %v2518_v19  ;;  %v719_v14 = vmul.f32 %v655_v41, %v3209_v37  ;;  %v3246_v47 = vadd.f32 %v3633_v57, %v2520_v22 }
 0x1fa   :  { %v3239_v40 = vpop.eup %2108  ;;  %v1183_v39 = vpack.c.bf16 %v1131_v29, %v1127_v33  ;;  %v656_v48 = vmul.f32 %v3228_v31, %v3228_v31  ;;  %v781_v63 = vmul.f32 0.044715, %v717_v5  ;;  %v718_v20 = vmul.f32 %v654_v51, %v3218_v34  ;;  %v3635_v33 = vld [vmem:[#allocation42_spill] sm:$0xff] }
 0x1fb   :  { %v3248_v44 = vpop.eup %2110  ;;  %1517 = vmatmul.mubr.bf16.gmra.mrb[40].mxu0 %v1181_v54  ;;  %v657_v19 = vmul.f32 %v3237_v18, %v3237_v18  ;;  %v3255_v29 = vadd.f32 %v3635_v33, %v2522_v23  ;;  %v783_v28 = vmul.f32 0.044715, %v719_v14  ;;  %v659_v0 = vmul.f32 %v3246_v47, %v3246_v47  ;;  %v3636_v54 = vld [vmem:[#allocation43_spill] sm:$0xff] }
 0x1fc   :  { %3634 = vst [vmem:[#allocation3_spill] sm:$0xff] %v3248_v44  ;;  %v3257_v41 = vpop.eup %2112  ;;  %1614 = vmatmul.mubr.bf16.gmra.mrb[40].mxu1 %v1183_v39  ;;  %v720_v22 = vmul.f32 %v656_v48, %v3228_v31  ;;  %v3264_v5 = vadd.f32 %v3636_v54, %v2524_v24  ;;  %v845_v51 = vadd.f32 %v781_v63, %v3202_v26  ;;  %v782_v57 = vmul.f32 0.044715, %v718_v20 }
 0x1fd   :  { %v721_v61 = vmul.f32 %v657_v19, %v3237_v18  ;;  %v658_v23 = vmul.f32 %v3255_v29, %v3255_v29  ;;  %v3270_v33 = vpop.eup %2114  ;;  %v847_v39 = vadd.f32 %v783_v28, %v3209_v37  ;;  %v723_v48 = vmul.f32 %v659_v0, %v3246_v47 }
 0x1fe   :  { %v784_v14 = vmul.f32 0.044715, %v720_v22  ;;  %v660_v6 = vmul.f32 %v3264_v5, %v3264_v5  ;;  %v909_v24 = vmul.f32 0.7978846, %v845_v51  ;;  %v846_v54 = vadd.f32 %v782_v57, %v3218_v34 }
 0x1ff   :  { %v785_v63 = vmul.f32 0.044715, %v721_v61  ;;  %v722_v20 = vmul.f32 %v658_v23, %v3255_v29  ;;  %v911_v19 = vmul.f32 0.7978846, %v847_v39  ;;  %v787_v62 = vmul.f32 0.044715, %v723_v48 }
 0x200   :  { %v848_v26 = vadd.f32 %v784_v14, %v3228_v31  ;;  %v724_v44 = vmul.f32 %v660_v6, %v3264_v5  ;;  %2116 = vtanh.f32 %v909_v24  ;;  %v910_v28 = vmul.f32 0.7978846, %v846_v54  ;;  %v3637_v54 = vld [vmem:[#allocation48_spill] sm:$0xff] }
 0x201   :  { %v849_v22 = vadd.f32 %v785_v63, %v3237_v18  ;;  %v786_v0 = vmul.f32 0.044715, %v722_v20  ;;  %2118 = vtanh.f32 %v911_v19  ;;  %v851_v51 = vadd.f32 %v787_v62, %v3246_v47  ;;  %v3638_v20 = vld [vmem:[#allocation22_spill] sm:$0xff] }
 0x202   :  { %v912_v37 = vmul.f32 0.7978846, %v848_v26  ;;  %v788_v36 = vmul.f32 0.044715, %v724_v44  ;;  %2120 = vtanh.f32 %v910_v28  ;;  %v1006_v23 = vadd.f32 1.0, %v2969_v35 }
 0x203   :  { %v913_v61 = vmul.f32 0.7978846, %v849_v22  ;;  %v850_v57 = vadd.f32 %v786_v0, %v3255_v29  ;;  %v915_v39 = vmul.f32 0.7978846, %v851_v51  ;;  %v1010_v14 = vadd.f32 1.0, %v2994_v7  ;;  %v3641_v51 = vld [vmem:[#allocation23_spill] sm:$0xff] }
 0x204   :  { %2122 = vtanh.f32 %v912_v37  ;;  %v852_v6 = vadd.f32 %v788_v36, %v3264_v5  ;;  %v1070_v24 = vmul.f32 0.5, %v1006_v23  ;;  %v1008_v26 = vadd.f32 1.0, %v3637_v54  ;;  %v3639_v37 = vld [vmem:[#allocation46_spill] sm:$0xff]  ;;  %v3642_v23 = vld [vmem:[#allocation47_spill] sm:$0xff] }
 0x205   :  { %2124 = vtanh.f32 %v913_v61  ;;  %v914_v48 = vmul.f32 0.7978846, %v850_v57  ;;  %v1074_v44 = vmul.f32 0.5, %v1010_v14  ;;  %v1012_v63 = vadd.f32 1.0, %v3001_v32  ;;  %v3640_v36 = vld [vmem:[#allocation30_spill] sm:$0xff]  ;;  %v3643_v14 = vld [vmem:[#allocation33_spill] sm:$0xff] }
 0x206   :  { %2126 = vtanh.f32 %v915_v39  ;;  %v916_v62 = vmul.f32 0.7978846, %v852_v6  ;;  %v1134_v19 = vmul.f32 %v1070_v24, %v3638_v20  ;;  %v1072_v35 = vmul.f32 0.5, %v1008_v26 }
 0x207   :  { %2128 = vtanh.f32 %v914_v48  ;;  %v1005_v28 = vadd.f32 1.0, %v3639_v37  ;;  %v1138_v22 = vmul.f32 %v1074_v44, %v3640_v36  ;;  %v1076_v7 = vmul.f32 0.5, %v1012_v63 }
 0x208   :  { %2130 = vtanh.f32 %v916_v62  ;;  %v1009_v0 = vadd.f32 1.0, %v2986_v16  ;;  %v1136_v61 = vmul.f32 %v1072_v35, %v3641_v51  ;;  %v1007_v39 = vadd.f32 1.0, %v3642_v23  ;;  %v3644_v62 = vld [vmem:[#allocation20_spill] sm:$0xff] }
 0x209   :  { %v1069_v57 = vmul.f32 0.5, %v1005_v28  ;;  %v1011_v6 = vadd.f32 1.0, %v2991_v56  ;;  %v1186_v32 = vpack.c.bf16 %v1138_v22, %v1134_v19  ;;  %v1140_v48 = vmul.f32 %v1076_v7, %v3643_v14  ;;  %v3645_v28 = vld [vmem:[#allocation24_spill] sm:$0xff] }
 0x20a   :  { %v1073_v24 = vmul.f32 0.5, %v1009_v0  ;;  %v1014_v54 = vadd.f32 1.0, %v3047_v15  ;;  %v3297_v26 = vpop.eup %2116  ;;  %v1071_v63 = vmul.f32 0.5, %v1007_v39  ;;  %v1018_v16 = vadd.f32 1.0, %v3084_v8  ;;  %v3646_v15 = vld [vmem:[#allocation21_spill] sm:$0xff] }
 0x20b   :  { %v1133_v44 = vmul.f32 %v1069_v57, %v3644_v62  ;;  %v1075_v20 = vmul.f32 0.5, %v1011_v6  ;;  %v3301_v35 = vpop.eup %2118  ;;  %1524 = vmatprep.mubr.bf16.mxu0 %v1186_v32  ;;  %v1188_v37 = vpack.c.bf16 %v1140_v48, %v1136_v61  ;;  %v1016_v36 = vadd.f32 1.0, %v3057_v43  ;;  %v3647_v0 = vld [vmem:[#allocation29_spill] sm:$0xff]  ;;  %v3648_v6 = vld [vmem:[#allocation44_spill] sm:$0xff] }
 0x20c   :  { %v1137_v56 = vmul.f32 %v1073_v24, %v3645_v28  ;;  %v1078_v19 = vmul.f32 0.5, %v1014_v54  ;;  %v3305_v22 = vpop.eup %2120  ;;  %v1135_v7 = vmul.f32 %v1071_v63, %v3646_v15  ;;  %v1082_v57 = vmul.f32 0.5, %v1018_v16 }
 0x20d   :  { %v1139_v51 = vmul.f32 %v1075_v20, %v3647_v0  ;;  %v1020_v23 = vadd.f32 1.0, %v3088_v27  ;;  %1621 = vmatprep.mubr.bf16.mxu1 %v1188_v37  ;;  %v1080_v32 = vmul.f32 0.5, %v1016_v36  ;;  %v1013_v14 = vadd.f32 1.0, %v3012_v45  ;;  %v3649_v27 = vld [vmem:[#allocation45_spill] sm:$0xff]  ;;  %v3650_v36 = vld [vmem:[#allocation34_spill] sm:$0xff] }
 0x20e   :  { %v3310_v39 = vpop.eup %2122  ;;  %v1185_v8 = vpack.c.bf16 %v1137_v56, %v1133_v44  ;;  %v1142_v61 = vmul.f32 %v1078_v19, %v3648_v6  ;;  %v1146_v24 = vmul.f32 %v1082_v57, %v2964_v60  ;;  %v1017_v62 = vadd.f32 1.0, %v3073_v2 }
 0x20f   :  { %v3314_v48 = vpop.eup %2124  ;;  %v1187_v43 = vpack.c.bf16 %v1139_v51, %v1135_v7  ;;  %v1084_v54 = vmul.f32 0.5, %v1020_v23  ;;  %v1144_v20 = vmul.f32 %v1080_v32, %v3649_v27  ;;  %v1077_v16 = vmul.f32 0.5, %v1013_v14 }
 0x210   :  { %v3318_v63 = vpop.eup %2126  ;;  %1525 = vmatmul.mubr.bf16.gmra.mrb[44].mxu0 %v1185_v8  ;;  %v1015_v44 = vadd.f32 1.0, %v3017_v52  ;;  %v1019_v37 = vadd.f32 1.0, %v3079_v1  ;;  %v1190_v45 = vpack.c.bf16 %v1146_v24, %v1142_v61  ;;  %v1081_v60 = vmul.f32 0.5, %v1017_v62  ;;  %v3651_v8 = vld [vmem:[#allocation37_spill] sm:$0xff] }
 0x211   :  { %v3323_v28 = vpop.eup %2128  ;;  %1622 = vmatmul.mubr.bf16.gmra.mrb[44].mxu1 %v1187_v43  ;;  %v1148_v56 = vmul.f32 %v1084_v54, %v2976_v30  ;;  %v1022_v19 = vadd.f32 1.0, %v3135_v17  ;;  %v1141_v15 = vmul.f32 %v1077_v16, %v3650_v36  ;;  %v1026_v51 = vadd.f32 1.0, %v3165_v59 }
 0x212   :  { %v3327_v2 = vpop.eup %2130  ;;  %v1079_v7 = vmul.f32 0.5, %v1015_v44  ;;  %v1083_v0 = vmul.f32 0.5, %v1019_v37  ;;  %1532 = vmatprep.mubr.bf16.mxu0 %v1190_v45  ;;  %v1145_v1 = vmul.f32 %v1081_v60, %v2946_v11  ;;  %v1024_v23 = vadd.f32 1.0, %v3141_v10  ;;  %v3652_v44 = vld [vmem:[#allocation49_spill] sm:$0xff] }
 0x213   :  { %v1192_v52 = vpack.c.bf16 %v1148_v56, %v1144_v20  ;;  %v1086_v57 = vmul.f32 0.5, %v1022_v19  ;;  %v1090_v17 = vmul.f32 0.5, %v1026_v51  ;;  %v1028_v61 = vadd.f32 1.0, %v3174_v50  ;;  %v3653_v56 = vld [vmem:[#allocation51_spill] sm:$0xff]  ;;  %v3654_v19 = vld [vmem:[#allocation50_spill] sm:$0xff]  ;;  %v3656_v51 = vld [vmem:[#allocation17_spill] sm:$0xff] }
 0x214   :  { %v1143_v30 = vmul.f32 %v1079_v7, %v3651_v8  ;;  %v1147_v6 = vmul.f32 %v1083_v0, %v2960_v55  ;;  %v1189_v32 = vpack.c.bf16 %v1145_v1, %v1141_v15  ;;  %v1088_v43 = vmul.f32 0.5, %v1024_v23 }
 0x215   :  { %1629 = vmatprep.mubr.bf16.mxu1 %v1192_v52  ;;  %v1150_v14 = vmul.f32 %v1086_v57, %v3024_v49  ;;  %v1021_v59 = vadd.f32 1.0, %v3108_v58  ;;  %v1154_v11 = vmul.f32 %v1090_v17, %v3055_v4  ;;  %v1092_v54 = vmul.f32 0.5, %v1028_v61  ;;  %v3657_v17 = vld [vmem:[#allocation25_spill] sm:$0xff] }
 0x216   :  { %v1191_v24 = vpack.c.bf16 %v1147_v6, %v1143_v30  ;;  %v1025_v10 = vadd.f32 1.0, %v3152_v38  ;;  %v1152_v62 = vmul.f32 %v1088_v43, %v3028_v25  ;;  %v1023_v55 = vadd.f32 1.0, %v3115_v21  ;;  %v3659_v43 = vld [vmem:[#allocation18_spill] sm:$0xff] }
 0x217   :  { %v1085_v27 = vmul.f32 0.5, %v1021_v59  ;;  %v1027_v50 = vadd.f32 1.0, %v3159_v53  ;;  %v1194_v20 = vpack.c.bf16 %v1154_v11, %v1150_v14  ;;  %v1156_v49 = vmul.f32 %v1092_v54, %v3063_v12  ;;  %v3655_v12 = vld [vmem:[#allocation52_spill] sm:$0xff] }
 0x218   :  { %1533 = vmatmul.mubr.bf16.gmra.mrb[48].mxu0 %v1189_v32  ;;  %v1089_v16 = vmul.f32 0.5, %v1025_v10  ;;  %v1030_v58 = vadd.f32 1.0, %v3220_v9  ;;  %v1087_v37 = vmul.f32 0.5, %v1023_v55  ;;  %v1034_v38 = vadd.f32 1.0, %v3257_v41  ;;  %v3658_v32 = vld [vmem:[#allocation3_spill] sm:$0xff] }
 0x219   :  { %1630 = vmatmul.mubr.bf16.gmra.mrb[48].mxu1 %v1191_v24  ;;  %v1149_v4 = vmul.f32 %v1085_v27, %v3652_v44  ;;  %v1091_v45 = vmul.f32 0.5, %v1027_v50  ;;  %1540 = vmatprep.mubr.bf16.mxu0 %v1194_v20  ;;  %v1196_v25 = vpack.c.bf16 %v1156_v49, %v1152_v62  ;;  %v1032_v53 = vadd.f32 1.0, %v3230_v42  ;;  %v3661_v62 = vld [vmem:[#allocation8_spill] sm:$0xff] }
 0x21a   :  { %v1153_v21 = vmul.f32 %v1089_v16, %v3653_v56  ;;  %v1094_v60 = vmul.f32 0.5, %v1030_v58  ;;  %v1151_v36 = vmul.f32 %v1087_v37, %v3654_v19  ;;  %v1098_v7 = vmul.f32 0.5, %v1034_v38  ;;  %v3662_v20 = vld [vmem:[#allocation4_spill] sm:$0xff]  ;;  %v3663_v16 = vld [vmem:[#allocation13_spill] sm:$0xff] }
 0x21b   :  { %v1155_v15 = vmul.f32 %v1091_v45, %v3655_v12  ;;  %v1036_v9 = vadd.f32 1.0, %v3270_v33  ;;  %1637 = vmatprep.mubr.bf16.mxu1 %v1196_v25  ;;  %v1096_v1 = vmul.f32 0.5, %v1032_v53  ;;  %v1029_v41 = vadd.f32 1.0, %v3204_v46  ;;  %v3660_v46 = vld [vmem:[#allocation7_spill] sm:$0xff] }
 0x21c   :  { %v1193_v0 = vpack.c.bf16 %v1153_v21, %v1149_v4  ;;  %v1158_v52 = vmul.f32 %v1094_v60, %v3656_v51  ;;  %v1162_v23 = vmul.f32 %v1098_v7, %v3157_v3  ;;  %v1033_v42 = vadd.f32 1.0, %v3239_v40  ;;  %v3664_v7 = vld [vmem:[#allocation2_spill] sm:$0xff] }
 0x21d   :  { %v1195_v57 = vpack.c.bf16 %v1155_v15, %v1151_v36  ;;  %v1100_v8 = vmul.f32 0.5, %v1036_v9  ;;  %v1160_v30 = vmul.f32 %v1096_v1, %v3129_v13  ;;  %v1093_v6 = vmul.f32 0.5, %v1029_v41  ;;  %v3383_v51 = vld [vmem:[%s3501_s4] ss:$0 sm:$0xff] }
 0x21e   :  { %v1031_v61 = vadd.f32 1.0, %v3657_v17  ;;  %v1035_v33 = vadd.f32 1.0, %v3658_v32  ;;  %v1198_v14 = vpack.c.bf16 %v1162_v23, %v1158_v52  ;;  %v1097_v24 = vmul.f32 0.5, %v1033_v42 }
 0x21f   :  { %v1164_v59 = vmul.f32 %v1100_v8, %v3659_v43  ;;  %v1038_v11 = vadd.f32 1.0, %v3305_v22  ;;  %v1157_v54 = vmul.f32 %v1093_v6, %v3660_v46  ;;  %v1042_v40 = vadd.f32 1.0, %v3323_v28 }
 0x220   :  { %1541 = vmatmul.mubr.bf16.gmra.mrb[52].mxu0 %v1193_v0  ;;  %v1095_v3 = vmul.f32 0.5, %v1031_v61  ;;  %v1099_v10 = vmul.f32 0.5, %v1035_v33  ;;  %v1161_v27 = vmul.f32 %v1097_v24, %v3661_v62  ;;  %v1040_v50 = vadd.f32 1.0, %v3310_v39  ;;  %v2132_v33 = vld [vmem:[%s3497_s0] sm:$0xff] }
 0x221   :  { %1638 = vmatmul.mubr.bf16.gmra.mrb[52].mxu1 %v1195_v57  ;;  %1548 = vmatprep.mubr.bf16.mxu0 %v1198_v14  ;;  %v1200_v13 = vpack.c.bf16 %v1164_v59, %v1160_v30  ;;  %v1102_v55 = vmul.f32 0.5, %v1038_v11  ;;  %v1106_v22 = vmul.f32 0.5, %v1042_v40  ;;  %v1044_v44 = vadd.f32 1.0, %v3327_v2 }
 0x222   :  { %v1159_v49 = vmul.f32 %v1095_v3, %v3662_v20  ;;  %v1163_v58 = vmul.f32 %v1099_v10, %v3663_v16  ;;  %v1197_v4 = vpack.c.bf16 %v1161_v27, %v1157_v54  ;;  %v1104_v28 = vmul.f32 0.5, %v1040_v50 }
 0x223   :  { %1645 = vmatprep.mubr.bf16.mxu1 %v1200_v13  ;;  %v1166_v37 = vmul.f32 %v1102_v55, %v3218_v34  ;;  %v1037_v45 = vadd.f32 1.0, %v3297_v26  ;;  %v1170_v25 = vmul.f32 %v1106_v22, %v3255_v29  ;;  %v1108_v56 = vmul.f32 0.5, %v1044_v44 }
 0x224   :  { %v1199_v38 = vpack.c.bf16 %v1163_v58, %v1159_v49  ;;  %v1041_v39 = vadd.f32 1.0, %v3314_v48  ;;  %v1039_v60 = vadd.f32 1.0, %v3301_v35  ;;  %v1043_v53 = vadd.f32 1.0, %v3318_v63  ;;  %v3665_v48 = vld [vmem:[#allocation5_spill] sm:$0xff] }
 0x225   :  { %v1101_v21 = vmul.f32 0.5, %v1037_v45  ;;  %v1202_v19 = vpack.c.bf16 %v1170_v25, %v1166_v37  ;;  %v1168_v2 = vmul.f32 %v1104_v28, %v3228_v31  ;;  %v1172_v36 = vmul.f32 %v1108_v56, %v3264_v5 }
 0x226   :  { %v1105_v34 = vmul.f32 0.5, %v1041_v39  ;;  %v1103_v12 = vmul.f32 0.5, %v1039_v60  ;;  %v1107_v15 = vmul.f32 0.5, %v1043_v53 }
 0x227   :  { %v1204_v26 = vpack.c.bf16 %v1172_v36, %v1168_v2  ;;  %v1165_v29 = vmul.f32 %v1101_v21, %v3664_v7 }
 0x228   :  { %1549 = vmatmul.mubr.bf16.gmra.mrb[56].mxu0 %v1197_v4  ;;  %v1169_v9 = vmul.f32 %v1105_v34, %v3237_v18  ;;  %v1167_v35 = vmul.f32 %v1103_v12, %v3665_v48  ;;  %v1171_v63 = vmul.f32 %v1107_v15, %v3246_v47 }
 0x229   :  { %1646 = vmatmul.mubr.bf16.gmra.mrb[56].mxu1 %v1199_v38  ;;  %1556 = vmatprep.mubr.bf16.mxu0 %v1202_v19 }
 0x22a   :  { %1653 = vmatprep.mubr.bf16.mxu1 %v1204_v26  ;;  %v1201_v0 = vpack.c.bf16 %v1169_v9, %v1165_v29  ;;  %v1203_v31 = vpack.c.bf16 %v1171_v63, %v1167_v35 }
 0x230   :  { %1557 = vmatmul.mubr.bf16.gmra.mrb[60].mxu0 %v1201_v0 }
 0x231   :  { %1654 = vmatmul.mubr.bf16.gmra.mrb[60].mxu1 %v1203_v31 }
 0x2a2   :  { %v1779_v5 = vpop.f32.mrb[32].mxu0 }
 0x2a3   :  { %v1780_v52 = vpop.f32.mrb[33].mxu0 }
 0x2a4   :  { %v1781_v1 = vadd.f32 %v1780_v52, %v1779_v5  ;;  %v1782_v18 = vpop.f32.mrb[34].mxu0 }
 0x2a5   :  { %v1783_v41 = vpop.f32.mrb[35].mxu0 }
 0x2a6   :  { %v1843_v57 = vpop.f32.mrb[32].mxu1  ;;  %v1503_v23 = vadd.f32 %v1781_v1, %v3383_v51  ;;  %v1784_v8 = vadd.f32 %v1783_v41, %v1782_v18 }
 0x2a7   :  { %v1844_v47 = vpop.f32.mrb[33].mxu1 }
 0x2a8   :  { %v1845_v42 = vadd.f32 %v1844_v47, %v1843_v57  ;;  %v1846_v30 = vpop.f32.mrb[34].mxu1  ;;  %v1506_v6 = vadd.f32 %v1784_v8, %v3383_v51 }
 0x2a9   :  { %v1847_v17 = vpop.f32.mrb[35].mxu1 }
 0x2aa   :  { %v1600_v61 = vadd.f32 %v1845_v42, %v1503_v23  ;;  %v1848_v32 = vadd.f32 %v1847_v17, %v1846_v30 }
 0x2ac   :  { %v1662_v14 = vadd.f32 %v2132_v33, %v1600_v61  ;;  %v1603_v43 = vadd.f32 %v1848_v32, %v1506_v6 }
 0x2ae   :  { %1678 = vst [vmem:[%s3502_s5] sm:$0xff] %v1662_v14 }
 0x2b5   :  { %v2133_v59 = vld [vmem:[%s3497_s0 + $0x8] sm:$0xff] }
 0x2b6   :  { %v1663_v24 = vadd.f32 %v2133_v59, %v1603_v43 }
 0x2b8   :  { %1679 = vst [vmem:[%s3502_s5 + $0x8] sm:$0xff] %v1663_v24  ;;  %v1785_v11 = vpop.f32.mrb[36].mxu0 }
 0x2b9   :  { %v1786_v46 = vpop.f32.mrb[37].mxu0 }
 0x2ba   :  { %v1849_v54 = vpop.f32.mrb[36].mxu1  ;;  %v1787_v3 = vadd.f32 %v1786_v46, %v1785_v11  ;;  %v1788_v10 = vpop.f32.mrb[38].mxu0 }
 0x2bb   :  { %v1850_v40 = vpop.f32.mrb[37].mxu1  ;;  %v1789_v13 = vpop.f32.mrb[39].mxu0 }
 0x2bc   :  { %v1511_v62 = vadd.f32 %v1787_v3, %v3383_v51  ;;  %v1851_v27 = vadd.f32 %v1850_v40, %v1849_v54  ;;  %v1852_v55 = vpop.f32.mrb[38].mxu1  ;;  %v1790_v50 = vadd.f32 %v1789_v13, %v1788_v10 }
 0x2bd   :  { %v1853_v20 = vpop.f32.mrb[39].mxu1 }
 0x2be   :  { %v1608_v49 = vadd.f32 %v1851_v27, %v1511_v62  ;;  %v1514_v16 = vadd.f32 %v1790_v50, %v3383_v51  ;;  %v1854_v58 = vadd.f32 %v1853_v20, %v1852_v55 }
 0x2bf   :  { %v2134_v22 = vld [vmem:[%s3497_s0 + $0x10] sm:$0xff] }
 0x2c0   :  { %v1664_v44 = vadd.f32 %v2134_v22, %v1608_v49  ;;  %v1611_v4 = vadd.f32 %v1854_v58, %v1514_v16 }
 0x2c2   :  { %1680 = vst [vmem:[%s3502_s5 + $0x10] sm:$0xff] %v1664_v44 }
 0x2c9   :  { %v2135_v37 = vld [vmem:[%s3497_s0 + $0x18] sm:$0xff] }
 0x2ca   :  { %v1665_v28 = vadd.f32 %v2135_v37, %v1611_v4 }
 0x2cc   :  { %1681 = vst [vmem:[%s3502_s5 + $0x18] sm:$0xff] %v1665_v28 }
 0x2ce   :  { %v1791_v45 = vpop.f32.mrb[40].mxu0 }
 0x2cf   :  { %v1855_v38 = vpop.f32.mrb[40].mxu1  ;;  %v1792_v25 = vpop.f32.mrb[41].mxu0 }
 0x2d0   :  { %v1793_v56 = vadd.f32 %v1792_v25, %v1791_v45  ;;  %v1856_v39 = vpop.f32.mrb[41].mxu1  ;;  %v1794_v21 = vpop.f32.mrb[42].mxu0 }
 0x2d1   :  { %v1857_v60 = vadd.f32 %v1856_v39, %v1855_v38  ;;  %v1858_v53 = vpop.f32.mrb[42].mxu1  ;;  %v1795_v19 = vpop.f32.mrb[43].mxu0 }
 0x2d2   :  { %v1519_v2 = vadd.f32 %v1793_v56, %v3383_v51  ;;  %v1796_v36 = vadd.f32 %v1795_v19, %v1794_v21  ;;  %v1859_v34 = vpop.f32.mrb[43].mxu1 }
 0x2d3   :  { %v1860_v12 = vadd.f32 %v1859_v34, %v1858_v53  ;;  %v2136_v7 = vld [vmem:[%s3497_s0 + $0x20] sm:$0xff] }
 0x2d4   :  { %v1616_v15 = vadd.f32 %v1857_v60, %v1519_v2  ;;  %v1522_v26 = vadd.f32 %v1796_v36, %v3383_v51 }
 0x2d6   :  { %v1666_v29 = vadd.f32 %v2136_v7, %v1616_v15  ;;  %v1619_v9 = vadd.f32 %v1860_v12, %v1522_v26 }
 0x2d8   :  { %1682 = vst [vmem:[%s3502_s5 + $0x20] sm:$0xff] %v1666_v29 }
 0x2df   :  { %v2137_v48 = vld [vmem:[%s3497_s0 + $0x28] sm:$0xff] }
 0x2e0   :  { %v1667_v35 = vadd.f32 %v2137_v48, %v1619_v9 }
 0x2e2   :  { %1683 = vst [vmem:[%s3502_s5 + $0x28] sm:$0xff] %v1667_v35 }
 0x2e3   :  { %v1797_v63 = vpop.f32.mrb[44].mxu0 }
 0x2e4   :  { %v1861_v0 = vpop.f32.mrb[44].mxu1  ;;  %v1798_v31 = vpop.f32.mrb[45].mxu0 }
 0x2e5   :  { %v1799_v5 = vadd.f32 %v1798_v31, %v1797_v63  ;;  %v1862_v52 = vpop.f32.mrb[45].mxu1  ;;  %v1800_v1 = vpop.f32.mrb[46].mxu0 }
 0x2e6   :  { %v1863_v18 = vadd.f32 %v1862_v52, %v1861_v0  ;;  %v1864_v41 = vpop.f32.mrb[46].mxu1  ;;  %v1801_v57 = vpop.f32.mrb[47].mxu0 }
 0x2e7   :  { %v1527_v23 = vadd.f32 %v1799_v5, %v3383_v51  ;;  %v1802_v8 = vadd.f32 %v1801_v57, %v1800_v1  ;;  %v1865_v47 = vpop.f32.mrb[47].mxu1 }
 0x2e8   :  { %v1866_v42 = vadd.f32 %v1865_v47, %v1864_v41 }
 0x2e9   :  { %v1624_v30 = vadd.f32 %v1863_v18, %v1527_v23  ;;  %v1530_v6 = vadd.f32 %v1802_v8, %v3383_v51  ;;  %v2138_v17 = vld [vmem:[%s3497_s0 + $0x30] sm:$0xff] }
 0x2eb   :  { %v1668_v61 = vadd.f32 %v2138_v17, %v1624_v30  ;;  %v1627_v32 = vadd.f32 %v1866_v42, %v1530_v6  ;;  %v1803_v33 = vpop.f32.mrb[48].mxu0 }
 0x2ec   :  { %v1867_v14 = vpop.f32.mrb[48].mxu1  ;;  %v1804_v43 = vpop.f32.mrb[49].mxu0 }
 0x2ed   :  { %1684 = vst [vmem:[%s3502_s5 + $0x30] sm:$0xff] %v1668_v61  ;;  %v1805_v11 = vadd.f32 %v1804_v43, %v1803_v33  ;;  %v1868_v46 = vpop.f32.mrb[49].mxu1  ;;  %v1806_v54 = vpop.f32.mrb[50].mxu0 }
 0x2ee   :  { %v1869_v3 = vadd.f32 %v1868_v46, %v1867_v14  ;;  %v1870_v10 = vpop.f32.mrb[50].mxu1  ;;  %v1807_v40 = vpop.f32.mrb[51].mxu0 }
 0x2ef   :  { %v1535_v13 = vadd.f32 %v1805_v11, %v3383_v51  ;;  %v1808_v62 = vadd.f32 %v1807_v40, %v1806_v54  ;;  %v1871_v27 = vpop.f32.mrb[51].mxu1 }
 0x2f0   :  { %v1872_v55 = vadd.f32 %v1871_v27, %v1870_v10 }
 0x2f1   :  { %v1632_v50 = vadd.f32 %v1869_v3, %v1535_v13  ;;  %v1538_v20 = vadd.f32 %v1808_v62, %v3383_v51 }
 0x2f3   :  { %v1635_v58 = vadd.f32 %v1872_v55, %v1538_v20  ;;  %v1809_v22 = vpop.f32.mrb[52].mxu0 }
 0x2f4   :  { %v2139_v59 = vld [vmem:[%s3497_s0 + $0x38] sm:$0xff]  ;;  %v1873_v44 = vpop.f32.mrb[52].mxu1  ;;  %v1810_v4 = vpop.f32.mrb[53].mxu0 }
 0x2f5   :  { %v1669_v24 = vadd.f32 %v2139_v59, %v1627_v32  ;;  %v1811_v45 = vadd.f32 %v1810_v4, %v1809_v22  ;;  %v1874_v38 = vpop.f32.mrb[53].mxu1  ;;  %v1812_v25 = vpop.f32.mrb[54].mxu0 }
 0x2f6   :  { %v1875_v56 = vadd.f32 %v1874_v38, %v1873_v44  ;;  %v1876_v39 = vpop.f32.mrb[54].mxu1  ;;  %v1813_v21 = vpop.f32.mrb[55].mxu0 }
 0x2f7   :  { %1685 = vst [vmem:[%s3502_s5 + $0x38] sm:$0xff] %v1669_v24  ;;  %v1543_v60 = vadd.f32 %v1811_v45, %v3383_v51  ;;  %v1814_v53 = vadd.f32 %v1813_v21, %v1812_v25  ;;  %v1877_v19 = vpop.f32.mrb[55].mxu1 }
 0x2f8   :  { %v1878_v2 = vadd.f32 %v1877_v19, %v1876_v39 }
 0x2f9   :  { %v1640_v36 = vadd.f32 %v1875_v56, %v1543_v60  ;;  %v1546_v34 = vadd.f32 %v1814_v53, %v3383_v51 }
 0x2fb   :  { %v1643_v26 = vadd.f32 %v1878_v2, %v1546_v34  ;;  %v1815_v7 = vpop.f32.mrb[56].mxu0 }
 0x2fc   :  { %v1879_v29 = vpop.f32.mrb[56].mxu1  ;;  %v1816_v9 = vpop.f32.mrb[57].mxu0 }
 0x2fd   :  { %v1817_v63 = vadd.f32 %v1816_v9, %v1815_v7  ;;  %v1880_v0 = vpop.f32.mrb[57].mxu1  ;;  %v1818_v31 = vpop.f32.mrb[58].mxu0 }
 0x2fe   :  { %v2140_v49 = vld [vmem:[%s3497_s0 + $0x40] sm:$0xff]  ;;  %v1881_v5 = vadd.f32 %v1880_v0, %v1879_v29  ;;  %v1882_v52 = vpop.f32.mrb[58].mxu1  ;;  %v1819_v1 = vpop.f32.mrb[59].mxu0 }
 0x2ff   :  { %v1670_v16 = vadd.f32 %v2140_v49, %v1632_v50  ;;  %v1551_v18 = vadd.f32 %v1817_v63, %v3383_v51  ;;  %v1820_v41 = vadd.f32 %v1819_v1, %v1818_v31  ;;  %v1883_v57 = vpop.f32.mrb[59].mxu1 }
 0x300   :  { %v1884_v23 = vadd.f32 %v1883_v57, %v1882_v52 }
 0x301   :  { %1686 = vst [vmem:[%s3502_s5 + $0x40] sm:$0xff] %v1670_v16  ;;  %v1648_v8 = vadd.f32 %v1881_v5, %v1551_v18  ;;  %v1554_v47 = vadd.f32 %v1820_v41, %v3383_v51 }
 0x303   :  { %v1651_v6 = vadd.f32 %v1884_v23, %v1554_v47  ;;  %v1821_v17 = vpop.f32.mrb[60].mxu0 }
 0x304   :  { %v1885_v61 = vpop.f32.mrb[60].mxu1  ;;  %v1822_v32 = vpop.f32.mrb[61].mxu0 }
 0x305   :  { %v1823_v43 = vadd.f32 %v1822_v32, %v1821_v17  ;;  %v1886_v59 = vpop.f32.mrb[61].mxu1  ;;  %v1824_v24 = vpop.f32.mrb[62].mxu0 }
 0x306   :  { %v1887_v11 = vadd.f32 %v1886_v59, %v1885_v61  ;;  %v1888_v46 = vpop.f32.mrb[62].mxu1  ;;  %v1825_v54 = vpop.f32.mrb[63].mxu0 }
 0x307   :  { %v1559_v3 = vadd.f32 %v1823_v43, %v3383_v51  ;;  %v1826_v10 = vadd.f32 %v1825_v54, %v1824_v24  ;;  %v1889_v40 = vpop.f32.mrb[63].mxu1 }
 0x308   :  { %v2141_v37 = vld [vmem:[%s3497_s0 + $0x48] sm:$0xff]  ;;  %v1890_v13 = vadd.f32 %v1889_v40, %v1888_v46 }
 0x309   :  { %v1671_v28 = vadd.f32 %v2141_v37, %v1635_v58  ;;  %v1656_v62 = vadd.f32 %v1887_v11, %v1559_v3  ;;  %v1562_v27 = vadd.f32 %v1826_v10, %v3383_v51 }
 0x30b   :  { %1687 = vst [vmem:[%s3502_s5 + $0x48] sm:$0xff] %v1671_v28  ;;  %v1659_v20 = vadd.f32 %v1890_v13, %v1562_v27 }
 0x312   :  { %v2142_v12 = vld [vmem:[%s3497_s0 + $0x50] sm:$0xff] }
 0x313   :  { %v1672_v15 = vadd.f32 %v2142_v12, %v1640_v36 }
 0x315   :  { %1688 = vst [vmem:[%s3502_s5 + $0x50] sm:$0xff] %v1672_v15 }
 0x31c   :  { %v2143_v48 = vld [vmem:[%s3497_s0 + $0x58] sm:$0xff] }
 0x31d   :  { %v1673_v35 = vadd.f32 %v2143_v48, %v1643_v26 }
 0x31f   :  { %1689 = vst [vmem:[%s3502_s5 + $0x58] sm:$0xff] %v1673_v35 }
 0x326   :  { %v2144_v42 = vld [vmem:[%s3497_s0 + $0x60] sm:$0xff] }
 0x327   :  { %v1674_v30 = vadd.f32 %v2144_v42, %v1648_v8 }
 0x329   :  { %1690 = vst [vmem:[%s3502_s5 + $0x60] sm:$0xff] %v1674_v30 }
 0x330   :  { %v2145_v33 = vld [vmem:[%s3497_s0 + $0x68] sm:$0xff] }
 0x331   :  { %v1675_v14 = vadd.f32 %v2145_v33, %v1651_v6 }
 0x333   :  { %1691 = vst [vmem:[%s3502_s5 + $0x68] sm:$0xff] %v1675_v14 }
 0x33a   :  { %v2146_v55 = vld [vmem:[%s3497_s0 + $0x70] sm:$0xff] }
 0x33b   :  { %v1676_v50 = vadd.f32 %v2146_v55, %v1656_v62 }
 0x33d   :  { %1692 = vst [vmem:[%s3502_s5 + $0x70] sm:$0xff] %v1676_v50 }
 0x344   :  { %v2147_v49 = vld [vmem:[%s3497_s0 + $0x78] sm:$0xff] }
 0x345   :  { %v1677_v16 = vadd.f32 %v2147_v49, %v1659_v20 }
 0x347   :  { %1693 = vst [vmem:[%s3502_s5 + $0x78] sm:$0xff] %v1677_v16 }

</bundles_post_ra>
